<compile_context>
chip_gen: v6e
topology: v6e:2x2x1
jax: 0.10.0
libtpu: 0.0.40
codegen_flags: <defaults>
</compile_context>

<pallas_src>
import jax
import jax.numpy as jnp
from jax.experimental import pallas as pl
from jax.experimental.pallas import tpu as pltpu

LN_EPS = 1e-5      # PyTorch nn.LayerNorm default
NEG_INF = -1e9


def _layernorm(x, g, b):
    mu = jnp.mean(x, axis=-1, keepdims=True)
    xc = x - mu
    var = jnp.mean(xc * xc, axis=-1, keepdims=True)
    return xc * jax.lax.rsqrt(var + LN_EPS) * g + b


def _vmem_capacity_bytes():
    """Per-core VMEM capacity; conservative fallbacks if the query fails."""
    try:
        cap = int(pltpu.get_tpu_info().vmem_capacity_bytes)
        if cap > 0:
            return cap
    except Exception:
        pass
    try:
        kind = jax.devices()[0].device_kind.lower()
        if ("v5" in kind) or ("v6" in kind):
            return 128 * 1024 * 1024
    except Exception:
        pass
    return 64 * 1024 * 1024            # v7x per-core VMEM (smallest of the three)


def _weight_bytes(d, d_ff, heads, d_kq, d_v):
    d_qkv = heads * (2 * d_kq + d_v)
    w_bf16 = d * d_qkv + heads * d_v * d + d * d_ff + d_ff * d
    b_f32 = d_qkv + d + d_ff + d + 4 * d
    return 2 * w_bf16 + 4 * b_f32


def _activation_bytes(bt, n, d, d_ff, heads, d_kq, d_v):
    """Approximate per-grid-step VMEM working set in bytes."""
    rows = bt * n
    a = 0
    a += 2 * 2 * rows * d * 4                    # stream in + out blocks (double buffered)
    a += rows * d * (4 + 2)                      # xh (f32 + bf16 copy)
    a += rows * heads * (2 * d_kq + d_v) * 4     # fused qkv (f32)
    a += bt * n * (2 * d_kq + d_v) * (4 + 2)     # one head's q/k/v slices
    a += bt * n * n * (4 + 4 + 2)                # one head's logits / probs (+bf16)
    a += rows * heads * d_v * 2                  # value slab scratch (bf16)
    a += 4 * rows * d * 4                        # att, s1, x1h, ffo (f32)
    a += rows * d_ff * (4 + 2)                   # h1 (f32 + bf16)
    return a


def _pick_batch_tile(n, b, d, d_ff, heads, d_kq, d_v, act_budget):
    divisors = [t for t in range(b, 0, -1) if b % t == 0]
    # Prefer >=2 grid steps: overlaps stream DMA with compute and keeps both
    # v7x TensorCores busy; the extra ~0.35us/step elsewhere is negligible.
    cands = [t for t in divisors if b // t >= 2] or divisors
    for t in cands:
        if _activation_bytes(t, n, d, d_ff, heads, d_kq, d_v) <= act_budget:
            return t
    return 1


def _make_kernel(n, bt, d, heads, d_kq, d_v, d_ff, mask_mode):
    d_qkv = 2 * d_kq + d_v
    scale = 1.0 / (d_kq ** 0.5)
    rows = bt * n
    f32, bf16 = jnp.float32, jnp.bfloat16

    def kernel(*refs):
        x_ref = refs[0]
        if mask_mode == "array":
            mask_ref, rest = refs[1], refs[2:]
        else:
            mask_ref, rest = None, refs[1:]
        (ln0g_ref, ln0b_ref, wqkv_ref, bqkv_ref, wout_ref, bout_ref,
         ln1g_ref, ln1b_ref, w1_ref, b1_ref, w2_ref, b2_ref,
         o_ref, vals_scr) = rest

        x2 = x_ref[...].reshape(rows, d)          # batch-major rows (bt*n, d)

        # ---- LayerNorm 0 (f32 statistics) ---------------------------------
        xh = _layernorm(x2, ln0g_ref[...], ln0b_ref[...])

        # ---- Fused QKV projection: one lane-dense MXU matmul ---------------
        qkv = jnp.dot(xh.astype(bf16), wqkv_ref[...],
                      preferred_element_type=f32) + bqkv_ref[...]
        qkv3 = qkv.reshape(bt, n, heads * d_qkv)  # leading-dim split only

        # ---- Attention mask -------------------------------------------------
        if mask_mode == "causal":
            r = jax.lax.broadcasted_iota(jnp.int32, (1, n, n), 1)
            c = jax.lax.broadcasted_iota(jnp.int32, (1, n, n), 2)
            keep = c <= r                          # (1, n, n), broadcasts over bt
        elif mask_mode == "array":
            add_mask = mask_ref[...][None]         # (1, n, n), broadcasts over bt

        # ---- Attention: einsums batched over the batch tile, one head at a
        #      time.  Each head's (bt, n, n) logits/probs die before the next
        #      head; its values land sublane-dense in the bf16 slab.
        for h in range(heads):
            base = h * d_qkv
            q = (qkv3[:, :, base:base + d_kq] * scale).astype(bf16)
            k = qkv3[:, :, base + d_kq:base + 2 * d_kq].astype(bf16)
            v = qkv3[:, :, base + 2 * d_kq:base + d_qkv].astype(bf16)
            s = jnp.einsum('bqd,bkd->bqk', q, k, preferred_element_type=f32)
            if mask_mode == "causal":
                s = jnp.where(keep, s, NEG_INF)
            elif mask_mode == "array":
                s = s + add_mask
            m = jnp.max(s, axis=-1, keepdims=True)
            p = jnp.exp(s - m)
            w = p * pl.reciprocal(jnp.sum(p, axis=-1, keepdims=True), approx=True)
            hv = jnp.einsum('bqk,bkd->bqd', w.astype(bf16), v,
                            preferred_element_type=f32)        # (bt, n, d_v)
            vals_scr[:, h * d_v:(h + 1) * d_v] = (
                hv.reshape(rows, d_v).astype(bf16))

        # ---- Output projection (single big-K MXU matmul) + residual --------
        att = jnp.dot(vals_scr[...], wout_ref[...],
                      preferred_element_type=f32) + bout_ref[...]
        s1 = x2 + att

        # ---- LayerNorm 1 + feed-forward -------------------------------------
        # TODO(synk): tile d_ff here (stream W1/W2 column slices) for models
        #             whose h1 / weights approach v7x's 64 MiB VMEM ceiling.
        x1h = _layernorm(s1, ln1g_ref[...], ln1b_ref[...])
        h1 = jnp.dot(x1h.astype(bf16), w1_ref[...],
                     preferred_element_type=f32) + b1_ref[...]
        h1 = jnp.maximum(h1, 0.0)
        ffo = jnp.dot(h1.astype(bf16), w2_ref[...],
                      preferred_element_type=f32) + b2_ref[...]

        o_ref[...] = (s1 + ffo).reshape(bt, n, d)

    return kernel


def transformer_block_pallas(stream_nbd, mask, params):
    """stream_nbd: (n, b, d_stream) f32, seq-first like the PyTorch module.
    mask: None | "causal" | additive (n, n) array.  Returns (n, b, d) f32."""
    n, b, d = stream_nbd.shape
    heads = params["heads"]
    d_kq = d // heads
    d_v = d // heads
    d_qkv = 2 * d_kq + d_v
    d_ff = params["w1"].shape[1]
    assert params["Wqkv"].shape == (d, heads * d_qkv)
    assert params["Wout"].shape == (heads * d_v, d)

    f32, bf16 = jnp.float32, jnp.bfloat16

    # ---- VMEM budget & batch-tile selection --------------------------------
    cap = _vmem_capacity_bytes()
    vmem_limit = min(int(cap * 0.8), cap - (4 << 20))
    wbytes = _weight_bytes(d, d_ff, heads, d_kq, d_v)
    act_budget = max(vmem_limit - 2 * wbytes - (2 << 20), 1 << 20)
    bt = _pick_batch_tile(n, b, d, d_ff, heads, d_kq, d_v, act_budget)
    grid = (b // bt,)
    rows = bt * n

    # ---- Operands: stream goes batch-major; weights bf16, biases/LN f32 ----
    x_bnd = jnp.transpose(stream_nbd.astype(f32), (1, 0, 2))    # (b, n, d)

    ln0g = params["ln0_g"].reshape(1, d).astype(f32)
    ln0b = params["ln0_b"].reshape(1, d).astype(f32)
    ln1g = params["ln1_g"].reshape(1, d).astype(f32)
    ln1b = params["ln1_b"].reshape(1, d).astype(f32)
    wqkv = params["Wqkv"].astype(bf16)                           # (d, H*d_qkv)
    bqkv = params["bqkv"].reshape(1, heads * d_qkv).astype(f32)
    wout = params["Wout"].astype(bf16)                           # (H*d_v, d)
    bout = params["bout"].reshape(1, d).astype(f32)
    w1 = params["w1"].astype(bf16)                               # (d, d_ff)
    b1 = params["b1"].reshape(1, d_ff).astype(f32)
    w2 = params["w2"].astype(bf16)                               # (d_ff, d)
    b2 = params["b2"].reshape(1, d).astype(f32)

    if mask is None:
        mask_mode = "none"
    elif isinstance(mask, str) and mask == "causal":
        mask_mode = "causal"
    else:
        mask_mode = "array"          # additive (n, n) mask, like the torch arg

    kernel = _make_kernel(n, bt, d, heads, d_kq, d_v, d_ff, mask_mode)

    operands = [x_bnd]
    if mask_mode == "array":
        operands.append(jnp.asarray(mask, f32))
    param_ops = [ln0g, ln0b, wqkv, bqkv, wout, bout, ln1g, ln1b, w1, b1, w2, b2]
    operands += param_ops

    stream_spec = pl.BlockSpec((bt, n, d), lambda i: (i, 0, 0))

    def call(single_buffer_params):
        def const_spec(shape):
            zeros = (0,) * len(shape)
            if single_buffer_params:
                return pl.BlockSpec(shape, lambda i, _z=zeros: _z,
                                    pipeline_mode=pl.Buffered(1))
            return pl.BlockSpec(shape, lambda i, _z=zeros: _z)

        in_specs = [stream_spec]
        if mask_mode == "array":
            in_specs.append(const_spec((n, n)))
        in_specs += [const_spec(p.shape) for p in param_ops]

        return pl.pallas_call(
            kernel,
            out_shape=jax.ShapeDtypeStruct((b, n, d), f32),
            grid=grid,
            in_specs=in_specs,
            out_specs=pl.BlockSpec((bt, n, d), lambda i: (i, 0, 0)),
            scratch_shapes=[pltpu.VMEM((rows, heads * d_v), bf16)],
            compiler_params=pltpu.CompilerParams(
                dimension_semantics=("parallel",),
                vmem_limit_bytes=vmem_limit),
        )(*operands)

    try:
        out_bnd = call(single_buffer_params=True)
    except Exception:
        # Fall back to default double-buffered parameter blocks if Buffered(1)
        # is rejected by this jax/Mosaic version.
        out_bnd = call(single_buffer_params=False)

    return jnp.transpose(out_bnd, (1, 0, 2))                    # back to (n, b, d)


# ---------------------------------------------------------------------------
# Pure-JAX f32 reference replicating the PyTorch forward exactly (validation).
# ---------------------------------------------------------------------------
def transformer_block_ref(stream, mask, params):
    n, b, d = stream.shape
    heads = params["heads"]
    d_kq = d // heads
    d_v = d // heads

    def layernorm(x, g, bta):
        mu = jnp.mean(x, axis=-1, keepdims=True)
        var = jnp.mean((x - mu) ** 2, axis=-1, keepdims=True)
        return (x - mu) * jax.lax.rsqrt(var + LN_EPS) * g + bta

    x = layernorm(stream, params["ln0_g"], params["ln0_b"])
    qkv = (x.reshape(n * b, d) @ params["Wqkv"] + params["bqkv"]
           ).reshape(n, b * heads, 2 * d_kq + d_v)
    q = qkv[:, :, :d_kq]
    k = qkv[:, :, d_kq:2 * d_kq]
    v = qkv[:, :, 2 * d_kq:]
    logits = jnp.einsum("nhc,mhc->hnm", q, k) / (d_kq ** 0.5)
    logits = logits + mask
    weights = jax.nn.softmax(logits, axis=-1)
    vals = jnp.einsum("hnm,mhc->nhc", weights, v)
    att = (vals.reshape(n * b, heads * d_v) @ params["Wout"] + params["bout"]
           ).reshape(n, b, d)
    s1 = stream + att
    x1 = layernorm(s1, params["ln1_g"], params["ln1_b"])
    h1 = jnp.maximum(x1 @ params["w1"] + params["b1"], 0.0)
    ffo = h1 @ params["w2"] + params["b2"]
    return s1 + ffo


if __name__ == "__main__":
    # Small, forward-consistent shapes: seq n=8, batch b=2, d_stream=32,
    # heads=4 (d_kq=d_v=8), size_ff=64.
    n, b, d_stream, heads, d_ff = 8, 2, 32, 4, 64
    d_kq = d_stream // heads
    d_v = d_stream // heads

    key = jax.random.PRNGKey(0)
    ks = jax.random.split(key, 16)

    params = {
        "heads": heads,
        "ln0_g": 1.0 + 0.1 * jax.random.normal(ks[0], (d_stream,), jnp.float32),
        "ln0_b": 0.1 * jax.random.normal(ks[1], (d_stream,), jnp.float32),
        "Wqkv": 0.05 * jax.random.normal(ks[2], (d_stream, heads * (2 * d_kq + d_v)), jnp.float32),
        "bqkv": 0.05 * jax.random.normal(ks[3], (heads * (2 * d_kq + d_v),), jnp.float32),
        "Wout": 0.05 * jax.random.normal(ks[4], (heads * d_v, d_stream), jnp.float32),
        "bout": 0.05 * jax.random.normal(ks[5], (d_stream,), jnp.float32),
        "ln1_g": 1.0 + 0.1 * jax.random.normal(ks[6], (d_stream,), jnp.float32),
        "ln1_b": 0.1 * jax.random.normal(ks[7], (d_stream,), jnp.float32),
        "w1": 0.05 * jax.random.normal(ks[8], (d_stream, d_ff), jnp.float32),
        "b1": 0.05 * jax.random.normal(ks[9], (d_ff,), jnp.float32),
        "w2": 0.05 * jax.random.normal(ks[10], (d_ff, d_stream), jnp.float32),
        "b2": 0.05 * jax.random.normal(ks[11], (d_stream,), jnp.float32),
    }

    stream = jax.random.normal(ks[12], (n, b, d_stream), jnp.float32)
    # Additive causal mask (n, n): 0 on/below diagonal, large negative above.
    causal = jnp.tril(jnp.ones((n, n), jnp.float32))
    mask_arr = jnp.where(causal > 0, 0.0, NEG_INF).astype(jnp.float32)

    ref = transformer_block_ref(stream, mask_arr, params)

    # Path 1: causal mask generated in-kernel (no (n, n) mask DMA).
    out = jax.block_until_ready(transformer_block_pallas(stream, "causal", params))
    assert out.shape == (n, b, d_stream)
    err = float(jnp.max(jnp.abs(out - ref)))
    assert jnp.allclose(out, ref, rtol=2e-2, atol=2e-2), f"causal-path mismatch: {err}"

    # Path 2: explicit additive mask array (module's general `mask` argument).
    out2 = jax.block_until_ready(transformer_block_pallas(stream, mask_arr, params))
    err2 = float(jnp.max(jnp.abs(out2 - ref)))
    assert jnp.allclose(out2, ref, rtol=2e-2, atol=2e-2), f"array-path mismatch: {err2}"

    print("KERNEL_OK")
</pallas_src>

<mosaic_0001>
module attributes {stable_mosaic.version = 11 : i64} {
  func.func @kernel(%arg0: i32, %arg1: memref<1x8x32xf32, #tpu.memory_space<vmem>>, %arg2: memref<1x32xf32, #tpu.memory_space<vmem>>, %arg3: memref<1x32xf32, #tpu.memory_space<vmem>>, %arg4: memref<32x96xbf16, #tpu.memory_space<vmem>>, %arg5: memref<1x96xf32, #tpu.memory_space<vmem>>, %arg6: memref<32x32xbf16, #tpu.memory_space<vmem>>, %arg7: memref<1x32xf32, #tpu.memory_space<vmem>>, %arg8: memref<1x32xf32, #tpu.memory_space<vmem>>, %arg9: memref<1x32xf32, #tpu.memory_space<vmem>>, %arg10: memref<32x64xbf16, #tpu.memory_space<vmem>>, %arg11: memref<1x64xf32, #tpu.memory_space<vmem>>, %arg12: memref<64x32xbf16, #tpu.memory_space<vmem>>, %arg13: memref<1x32xf32, #tpu.memory_space<vmem>>, %arg14: memref<1x8x32xf32, #tpu.memory_space<vmem>>, %arg15: memref<8x32xbf16, #tpu.memory_space<vmem>>) attributes {dimension_semantics = [#tpu.dimension_semantics<parallel>], iteration_bounds = array<i64: 2>, scalar_prefetch = 0 : i64, scratch_operands = 1 : i64, tpu.core_type = #tpu.core_type<tc>, window_params = [{transform_indices = @transform_0, window_bounds = array<i64: 1, 8, 32>}, {pipeline_mode = #tpu.pipeline_mode<synchronous>, transform_indices = @transform_1, window_bounds = array<i64: 1, 32>}, {pipeline_mode = #tpu.pipeline_mode<synchronous>, transform_indices = @transform_2, window_bounds = array<i64: 1, 32>}, {pipeline_mode = #tpu.pipeline_mode<synchronous>, transform_indices = @transform_3, window_bounds = array<i64: 32, 96>}, {pipeline_mode = #tpu.pipeline_mode<synchronous>, transform_indices = @transform_4, window_bounds = array<i64: 1, 96>}, {pipeline_mode = #tpu.pipeline_mode<synchronous>, transform_indices = @transform_5, window_bounds = array<i64: 32, 32>}, {pipeline_mode = #tpu.pipeline_mode<synchronous>, transform_indices = @transform_6, window_bounds = array<i64: 1, 32>}, {pipeline_mode = #tpu.pipeline_mode<synchronous>, transform_indices = @transform_7, window_bounds = array<i64: 1, 32>}, {pipeline_mode = #tpu.pipeline_mode<synchronous>, transform_indices = @transform_8, window_bounds = array<i64: 1, 32>}, {pipeline_mode = #tpu.pipeline_mode<synchronous>, transform_indices = @transform_9, window_bounds = array<i64: 32, 64>}, {pipeline_mode = #tpu.pipeline_mode<synchronous>, transform_indices = @transform_10, window_bounds = array<i64: 1, 64>}, {pipeline_mode = #tpu.pipeline_mode<synchronous>, transform_indices = @transform_11, window_bounds = array<i64: 64, 32>}, {pipeline_mode = #tpu.pipeline_mode<synchronous>, transform_indices = @transform_12, window_bounds = array<i64: 1, 32>}, {transform_indices = @transform_13, window_bounds = array<i64: 1, 8, 32>}]} {
    %c0 = arith.constant 0 : index
    %c0_0 = arith.constant 0 : index
    %c0_1 = arith.constant 0 : index
    %0 = vector.load %arg1[%c0, %c0_0, %c0_1] : memref<1x8x32xf32, #tpu.memory_space<vmem>>, vector<1x8x32xf32>
    %1 = vector.shape_cast %0 : vector<1x8x32xf32> to vector<8x32xf32>
    %c0_2 = arith.constant 0 : index
    %c0_3 = arith.constant 0 : index
    %2 = vector.load %arg2[%c0_2, %c0_3] : memref<1x32xf32, #tpu.memory_space<vmem>>, vector<1x32xf32>
    %c0_4 = arith.constant 0 : index
    %c0_5 = arith.constant 0 : index
    %3 = vector.load %arg3[%c0_4, %c0_5] : memref<1x32xf32, #tpu.memory_space<vmem>>, vector<1x32xf32>
    %cst = arith.constant dense<0.000000e+00> : vector<8xf32>
    %4 = vector.multi_reduction <add>, %1, %cst [1] : vector<8x32xf32> to vector<8xf32>
    %5 = vector.shape_cast %4 : vector<8xf32> to vector<8x1xf32>
    %cst_6 = arith.constant 3.200000e+01 : f32
    %6 = vector.broadcast %cst_6 : f32 to vector<8x1xf32>
    %7 = arith.divf %5, %6 : vector<8x1xf32>
    %8 = vector.broadcast %7 : vector<8x1xf32> to vector<8x32xf32>
    %9 = arith.subf %1, %8 : vector<8x32xf32>
    %10 = arith.mulf %9, %9 : vector<8x32xf32>
    %cst_7 = arith.constant dense<0.000000e+00> : vector<8xf32>
    %11 = vector.multi_reduction <add>, %10, %cst_7 [1] : vector<8x32xf32> to vector<8xf32>
    %12 = vector.shape_cast %11 : vector<8xf32> to vector<8x1xf32>
    %cst_8 = arith.constant 3.200000e+01 : f32
    %13 = vector.broadcast %cst_8 : f32 to vector<8x1xf32>
    %14 = arith.divf %12, %13 : vector<8x1xf32>
    %cst_9 = arith.constant 9.99999974E-6 : f32
    %15 = vector.broadcast %cst_9 : f32 to vector<8x1xf32>
    %16 = arith.addf %14, %15 : vector<8x1xf32>
    %17 = math.rsqrt %16 : vector<8x1xf32>
    %18 = vector.broadcast %17 : vector<8x1xf32> to vector<8x32xf32>
    %19 = arith.mulf %9, %18 : vector<8x32xf32>
    %20 = vector.broadcast %2 : vector<1x32xf32> to vector<8x32xf32>
    %21 = arith.mulf %19, %20 : vector<8x32xf32>
    %22 = vector.broadcast %3 : vector<1x32xf32> to vector<8x32xf32>
    %23 = arith.addf %21, %22 : vector<8x32xf32>
    %24 = arith.truncf %23 : vector<8x32xf32> to vector<8x32xbf16>
    %c0_10 = arith.constant 0 : index
    %c0_11 = arith.constant 0 : index
    %25 = vector.load %arg4[%c0_10, %c0_11] : memref<32x96xbf16, #tpu.memory_space<vmem>>, vector<32x96xbf16>
    %cst_12 = arith.constant dense<0.000000e+00> : vector<8x96xf32>
    %26 = tpu.matmul %24, %25, %cst_12 {dimension_numbers = #tpu.dot_dimension_numbers<[1], [0], [0], [1], [0, 0, 1, 1], [], []>} : vector<8x32xbf16>, vector<32x96xbf16>, vector<8x96xf32> -> vector<8x96xf32>
    %c0_13 = arith.constant 0 : index
    %c0_14 = arith.constant 0 : index
    %27 = vector.load %arg5[%c0_13, %c0_14] : memref<1x96xf32, #tpu.memory_space<vmem>>, vector<1x96xf32>
    %28 = vector.broadcast %27 : vector<1x96xf32> to vector<8x96xf32>
    %29 = arith.addf %26, %28 : vector<8x96xf32>
    %30 = vector.shape_cast %29 : vector<8x96xf32> to vector<1x8x96xf32>
    %31 = tpu.iota {dimensions = array<i32: 1>} : vector<1x8x8xi32>
    %32 = tpu.iota {dimensions = array<i32: 2>} : vector<1x8x8xi32>
    %33 = arith.cmpi sle, %32, %31 : vector<1x8x8xi32>
    %34 = vector.extract_strided_slice %30 {offsets = [0, 0, 0], sizes = [1, 8, 8], strides = [1, 1, 1]} : vector<1x8x96xf32> to vector<1x8x8xf32>
    %cst_15 = arith.constant 0.353553385 : f32
    %35 = vector.broadcast %cst_15 : f32 to vector<1x8x8xf32>
    %36 = arith.mulf %34, %35 : vector<1x8x8xf32>
    %37 = arith.truncf %36 : vector<1x8x8xf32> to vector<1x8x8xbf16>
    %38 = vector.extract_strided_slice %30 {offsets = [0, 0, 8], sizes = [1, 8, 8], strides = [1, 1, 1]} : vector<1x8x96xf32> to vector<1x8x8xf32>
    %39 = arith.truncf %38 : vector<1x8x8xf32> to vector<1x8x8xbf16>
    %40 = vector.extract_strided_slice %30 {offsets = [0, 0, 16], sizes = [1, 8, 8], strides = [1, 1, 1]} : vector<1x8x96xf32> to vector<1x8x8xf32>
    %41 = arith.truncf %40 : vector<1x8x8xf32> to vector<1x8x8xbf16>
    "tpu.trace_start"() <{level = 10 : i32, message = "bqd,bkd->bqk"}> : () -> ()
    %cst_16 = arith.constant dense<0.000000e+00> : vector<1x8x8xf32>
    %42 = tpu.matmul %37, %39, %cst_16 {dimension_numbers = #tpu.dot_dimension_numbers<[2], [2], [1], [1], [0, 0, 0, 1, 1, 1], [0], [0]>} : vector<1x8x8xbf16>, vector<1x8x8xbf16>, vector<1x8x8xf32> -> vector<1x8x8xf32>
    %cst_17 = arith.constant -1.000000e+09 : f32
    "tpu.trace_stop"() : () -> ()
    %43 = vector.broadcast %cst_17 : f32 to vector<1x8x8xf32>
    %44 = arith.select %33, %42, %43 : vector<1x8x8xi1>, vector<1x8x8xf32>
    %cst_18 = arith.constant dense<0xFF800000> : vector<1x8xf32>
    %45 = vector.multi_reduction <maximumf>, %44, %cst_18 [2] : vector<1x8x8xf32> to vector<1x8xf32>
    %46 = vector.shape_cast %45 : vector<1x8xf32> to vector<1x8x1xf32>
    %47 = vector.broadcast %46 : vector<1x8x1xf32> to vector<1x8x8xf32>
    %48 = arith.subf %44, %47 : vector<1x8x8xf32>
    %49 = math.exp %48 : vector<1x8x8xf32>
    %cst_19 = arith.constant dense<0.000000e+00> : vector<1x8xf32>
    %50 = vector.multi_reduction <add>, %49, %cst_19 [2] : vector<1x8x8xf32> to vector<1x8xf32>
    %51 = vector.shape_cast %50 : vector<1x8xf32> to vector<1x8x1xf32>
    %52 = tpu.reciprocal %51 {approx = true} : vector<1x8x1xf32> -> vector<1x8x1xf32>
    %53 = vector.broadcast %52 : vector<1x8x1xf32> to vector<1x8x8xf32>
    %54 = arith.mulf %49, %53 : vector<1x8x8xf32>
    %55 = arith.truncf %54 : vector<1x8x8xf32> to vector<1x8x8xbf16>
    "tpu.trace_start"() <{level = 10 : i32, message = "bqk,bkd->bqd"}> : () -> ()
    %cst_20 = arith.constant dense<0.000000e+00> : vector<1x8x8xf32>
    %56 = tpu.matmul %55, %41, %cst_20 {dimension_numbers = #tpu.dot_dimension_numbers<[2], [1], [1], [2], [0, 0, 0, 1, 1, 2], [0], [0]>} : vector<1x8x8xbf16>, vector<1x8x8xbf16>, vector<1x8x8xf32> -> vector<1x8x8xf32>
    "tpu.trace_stop"() : () -> ()
    %57 = vector.shape_cast %56 : vector<1x8x8xf32> to vector<8x8xf32>
    %58 = arith.truncf %57 : vector<8x8xf32> to vector<8x8xbf16>
    %c0_21 = arith.constant 0 : index
    %c0_22 = arith.constant 0 : index
    %59 = vector.load %arg15[%c0_21, %c0_22] : memref<8x32xbf16, #tpu.memory_space<vmem>>, vector<8x8xbf16>
    tpu.vector_store %arg15[%c0_21, %c0_22], %58 {strides = array<i32>} : memref<8x32xbf16, #tpu.memory_space<vmem>>, vector<8x8xbf16>,
    %60 = vector.extract_strided_slice %30 {offsets = [0, 0, 24], sizes = [1, 8, 8], strides = [1, 1, 1]} : vector<1x8x96xf32> to vector<1x8x8xf32>
    %cst_23 = arith.constant 0.353553385 : f32
    %61 = vector.broadcast %cst_23 : f32 to vector<1x8x8xf32>
    %62 = arith.mulf %60, %61 : vector<1x8x8xf32>
    %63 = arith.truncf %62 : vector<1x8x8xf32> to vector<1x8x8xbf16>
    %64 = vector.extract_strided_slice %30 {offsets = [0, 0, 32], sizes = [1, 8, 8], strides = [1, 1, 1]} : vector<1x8x96xf32> to vector<1x8x8xf32>
    %65 = arith.truncf %64 : vector<1x8x8xf32> to vector<1x8x8xbf16>
    %66 = vector.extract_strided_slice %30 {offsets = [0, 0, 40], sizes = [1, 8, 8], strides = [1, 1, 1]} : vector<1x8x96xf32> to vector<1x8x8xf32>
    %67 = arith.truncf %66 : vector<1x8x8xf32> to vector<1x8x8xbf16>
    "tpu.trace_start"() <{level = 10 : i32, message = "bqd,bkd->bqk"}> : () -> ()
    %cst_24 = arith.constant dense<0.000000e+00> : vector<1x8x8xf32>
    %68 = tpu.matmul %63, %65, %cst_24 {dimension_numbers = #tpu.dot_dimension_numbers<[2], [2], [1], [1], [0, 0, 0, 1, 1, 1], [0], [0]>} : vector<1x8x8xbf16>, vector<1x8x8xbf16>, vector<1x8x8xf32> -> vector<1x8x8xf32>
    %cst_25 = arith.constant -1.000000e+09 : f32
    "tpu.trace_stop"() : () -> ()
    %69 = vector.broadcast %cst_25 : f32 to vector<1x8x8xf32>
    %70 = arith.select %33, %68, %69 : vector<1x8x8xi1>, vector<1x8x8xf32>
    %cst_26 = arith.constant dense<0xFF800000> : vector<1x8xf32>
    %71 = vector.multi_reduction <maximumf>, %70, %cst_26 [2] : vector<1x8x8xf32> to vector<1x8xf32>
    %72 = vector.shape_cast %71 : vector<1x8xf32> to vector<1x8x1xf32>
    %73 = vector.broadcast %72 : vector<1x8x1xf32> to vector<1x8x8xf32>
    %74 = arith.subf %70, %73 : vector<1x8x8xf32>
    %75 = math.exp %74 : vector<1x8x8xf32>
    %cst_27 = arith.constant dense<0.000000e+00> : vector<1x8xf32>
    %76 = vector.multi_reduction <add>, %75, %cst_27 [2] : vector<1x8x8xf32> to vector<1x8xf32>
    %77 = vector.shape_cast %76 : vector<1x8xf32> to vector<1x8x1xf32>
    %78 = tpu.reciprocal %77 {approx = true} : vector<1x8x1xf32> -> vector<1x8x1xf32>
    %79 = vector.broadcast %78 : vector<1x8x1xf32> to vector<1x8x8xf32>
    %80 = arith.mulf %75, %79 : vector<1x8x8xf32>
    %81 = arith.truncf %80 : vector<1x8x8xf32> to vector<1x8x8xbf16>
    "tpu.trace_start"() <{level = 10 : i32, message = "bqk,bkd->bqd"}> : () -> ()
    %cst_28 = arith.constant dense<0.000000e+00> : vector<1x8x8xf32>
    %82 = tpu.matmul %81, %67, %cst_28 {dimension_numbers = #tpu.dot_dimension_numbers<[2], [1], [1], [2], [0, 0, 0, 1, 1, 2], [0], [0]>} : vector<1x8x8xbf16>, vector<1x8x8xbf16>, vector<1x8x8xf32> -> vector<1x8x8xf32>
    "tpu.trace_stop"() : () -> ()
    %83 = vector.shape_cast %82 : vector<1x8x8xf32> to vector<8x8xf32>
    %84 = arith.truncf %83 : vector<8x8xf32> to vector<8x8xbf16>
    %c0_29 = arith.constant 0 : index
    %c8 = arith.constant 8 : index
    %85 = vector.load %arg15[%c0_29, %c8] : memref<8x32xbf16, #tpu.memory_space<vmem>>, vector<8x8xbf16>
    tpu.vector_store %arg15[%c0_29, %c8], %84 {strides = array<i32>} : memref<8x32xbf16, #tpu.memory_space<vmem>>, vector<8x8xbf16>,
    %86 = vector.extract_strided_slice %30 {offsets = [0, 0, 48], sizes = [1, 8, 8], strides = [1, 1, 1]} : vector<1x8x96xf32> to vector<1x8x8xf32>
    %cst_30 = arith.constant 0.353553385 : f32
    %87 = vector.broadcast %cst_30 : f32 to vector<1x8x8xf32>
    %88 = arith.mulf %86, %87 : vector<1x8x8xf32>
    %89 = arith.truncf %88 : vector<1x8x8xf32> to vector<1x8x8xbf16>
    %90 = vector.extract_strided_slice %30 {offsets = [0, 0, 56], sizes = [1, 8, 8], strides = [1, 1, 1]} : vector<1x8x96xf32> to vector<1x8x8xf32>
    %91 = arith.truncf %90 : vector<1x8x8xf32> to vector<1x8x8xbf16>
    %92 = vector.extract_strided_slice %30 {offsets = [0, 0, 64], sizes = [1, 8, 8], strides = [1, 1, 1]} : vector<1x8x96xf32> to vector<1x8x8xf32>
    %93 = arith.truncf %92 : vector<1x8x8xf32> to vector<1x8x8xbf16>
    "tpu.trace_start"() <{level = 10 : i32, message = "bqd,bkd->bqk"}> : () -> ()
    %cst_31 = arith.constant dense<0.000000e+00> : vector<1x8x8xf32>
    %94 = tpu.matmul %89, %91, %cst_31 {dimension_numbers = #tpu.dot_dimension_numbers<[2], [2], [1], [1], [0, 0, 0, 1, 1, 1], [0], [0]>} : vector<1x8x8xbf16>, vector<1x8x8xbf16>, vector<1x8x8xf32> -> vector<1x8x8xf32>
    %cst_32 = arith.constant -1.000000e+09 : f32
    "tpu.trace_stop"() : () -> ()
    %95 = vector.broadcast %cst_32 : f32 to vector<1x8x8xf32>
    %96 = arith.select %33, %94, %95 : vector<1x8x8xi1>, vector<1x8x8xf32>
    %cst_33 = arith.constant dense<0xFF800000> : vector<1x8xf32>
    %97 = vector.multi_reduction <maximumf>, %96, %cst_33 [2] : vector<1x8x8xf32> to vector<1x8xf32>
    %98 = vector.shape_cast %97 : vector<1x8xf32> to vector<1x8x1xf32>
    %99 = vector.broadcast %98 : vector<1x8x1xf32> to vector<1x8x8xf32>
    %100 = arith.subf %96, %99 : vector<1x8x8xf32>
    %101 = math.exp %100 : vector<1x8x8xf32>
    %cst_34 = arith.constant dense<0.000000e+00> : vector<1x8xf32>
    %102 = vector.multi_reduction <add>, %101, %cst_34 [2] : vector<1x8x8xf32> to vector<1x8xf32>
    %103 = vector.shape_cast %102 : vector<1x8xf32> to vector<1x8x1xf32>
    %104 = tpu.reciprocal %103 {approx = true} : vector<1x8x1xf32> -> vector<1x8x1xf32>
    %105 = vector.broadcast %104 : vector<1x8x1xf32> to vector<1x8x8xf32>
    %106 = arith.mulf %101, %105 : vector<1x8x8xf32>
    %107 = arith.truncf %106 : vector<1x8x8xf32> to vector<1x8x8xbf16>
    "tpu.trace_start"() <{level = 10 : i32, message = "bqk,bkd->bqd"}> : () -> ()
    %cst_35 = arith.constant dense<0.000000e+00> : vector<1x8x8xf32>
    %108 = tpu.matmul %107, %93, %cst_35 {dimension_numbers = #tpu.dot_dimension_numbers<[2], [1], [1], [2], [0, 0, 0, 1, 1, 2], [0], [0]>} : vector<1x8x8xbf16>, vector<1x8x8xbf16>, vector<1x8x8xf32> -> vector<1x8x8xf32>
    "tpu.trace_stop"() : () -> ()
    %109 = vector.shape_cast %108 : vector<1x8x8xf32> to vector<8x8xf32>
    %110 = arith.truncf %109 : vector<8x8xf32> to vector<8x8xbf16>
    %c0_36 = arith.constant 0 : index
    %c16 = arith.constant 16 : index
    %111 = vector.load %arg15[%c0_36, %c16] : memref<8x32xbf16, #tpu.memory_space<vmem>>, vector<8x8xbf16>
    tpu.vector_store %arg15[%c0_36, %c16], %110 {strides = array<i32>} : memref<8x32xbf16, #tpu.memory_space<vmem>>, vector<8x8xbf16>,
    %112 = vector.extract_strided_slice %30 {offsets = [0, 0, 72], sizes = [1, 8, 8], strides = [1, 1, 1]} : vector<1x8x96xf32> to vector<1x8x8xf32>
    %cst_37 = arith.constant 0.353553385 : f32
    %113 = vector.broadcast %cst_37 : f32 to vector<1x8x8xf32>
    %114 = arith.mulf %112, %113 : vector<1x8x8xf32>
    %115 = arith.truncf %114 : vector<1x8x8xf32> to vector<1x8x8xbf16>
    %116 = vector.extract_strided_slice %30 {offsets = [0, 0, 80], sizes = [1, 8, 8], strides = [1, 1, 1]} : vector<1x8x96xf32> to vector<1x8x8xf32>
    %117 = arith.truncf %116 : vector<1x8x8xf32> to vector<1x8x8xbf16>
    %118 = vector.extract_strided_slice %30 {offsets = [0, 0, 88], sizes = [1, 8, 8], strides = [1, 1, 1]} : vector<1x8x96xf32> to vector<1x8x8xf32>
    %119 = arith.truncf %118 : vector<1x8x8xf32> to vector<1x8x8xbf16>
    "tpu.trace_start"() <{level = 10 : i32, message = "bqd,bkd->bqk"}> : () -> ()
    %cst_38 = arith.constant dense<0.000000e+00> : vector<1x8x8xf32>
    %120 = tpu.matmul %115, %117, %cst_38 {dimension_numbers = #tpu.dot_dimension_numbers<[2], [2], [1], [1], [0, 0, 0, 1, 1, 1], [0], [0]>} : vector<1x8x8xbf16>, vector<1x8x8xbf16>, vector<1x8x8xf32> -> vector<1x8x8xf32>
    %cst_39 = arith.constant -1.000000e+09 : f32
    "tpu.trace_stop"() : () -> ()
    %121 = vector.broadcast %cst_39 : f32 to vector<1x8x8xf32>
    %122 = arith.select %33, %120, %121 : vector<1x8x8xi1>, vector<1x8x8xf32>
    %cst_40 = arith.constant dense<0xFF800000> : vector<1x8xf32>
    %123 = vector.multi_reduction <maximumf>, %122, %cst_40 [2] : vector<1x8x8xf32> to vector<1x8xf32>
    %124 = vector.shape_cast %123 : vector<1x8xf32> to vector<1x8x1xf32>
    %125 = vector.broadcast %124 : vector<1x8x1xf32> to vector<1x8x8xf32>
    %126 = arith.subf %122, %125 : vector<1x8x8xf32>
    %127 = math.exp %126 : vector<1x8x8xf32>
    %cst_41 = arith.constant dense<0.000000e+00> : vector<1x8xf32>
    %128 = vector.multi_reduction <add>, %127, %cst_41 [2] : vector<1x8x8xf32> to vector<1x8xf32>
    %129 = vector.shape_cast %128 : vector<1x8xf32> to vector<1x8x1xf32>
    %130 = tpu.reciprocal %129 {approx = true} : vector<1x8x1xf32> -> vector<1x8x1xf32>
    %131 = vector.broadcast %130 : vector<1x8x1xf32> to vector<1x8x8xf32>
    %132 = arith.mulf %127, %131 : vector<1x8x8xf32>
    %133 = arith.truncf %132 : vector<1x8x8xf32> to vector<1x8x8xbf16>
    "tpu.trace_start"() <{level = 10 : i32, message = "bqk,bkd->bqd"}> : () -> ()
    %cst_42 = arith.constant dense<0.000000e+00> : vector<1x8x8xf32>
    %134 = tpu.matmul %133, %119, %cst_42 {dimension_numbers = #tpu.dot_dimension_numbers<[2], [1], [1], [2], [0, 0, 0, 1, 1, 2], [0], [0]>} : vector<1x8x8xbf16>, vector<1x8x8xbf16>, vector<1x8x8xf32> -> vector<1x8x8xf32>
    "tpu.trace_stop"() : () -> ()
    %135 = vector.shape_cast %134 : vector<1x8x8xf32> to vector<8x8xf32>
    %136 = arith.truncf %135 : vector<8x8xf32> to vector<8x8xbf16>
    %c0_43 = arith.constant 0 : index
    %c24 = arith.constant 24 : index
    %137 = vector.load %arg15[%c0_43, %c24] : memref<8x32xbf16, #tpu.memory_space<vmem>>, vector<8x8xbf16>
    tpu.vector_store %arg15[%c0_43, %c24], %136 {strides = array<i32>} : memref<8x32xbf16, #tpu.memory_space<vmem>>, vector<8x8xbf16>,
    %c0_44 = arith.constant 0 : index
    %c0_45 = arith.constant 0 : index
    %138 = vector.load %arg15[%c0_44, %c0_45] : memref<8x32xbf16, #tpu.memory_space<vmem>>, vector<8x32xbf16>
    %c0_46 = arith.constant 0 : index
    %c0_47 = arith.constant 0 : index
    %139 = vector.load %arg6[%c0_46, %c0_47] : memref<32x32xbf16, #tpu.memory_space<vmem>>, vector<32x32xbf16>
    %cst_48 = arith.constant dense<0.000000e+00> : vector<8x32xf32>
    %140 = tpu.matmul %138, %139, %cst_48 {dimension_numbers = #tpu.dot_dimension_numbers<[1], [0], [0], [1], [0, 0, 1, 1], [], []>} : vector<8x32xbf16>, vector<32x32xbf16>, vector<8x32xf32> -> vector<8x32xf32>
    %c0_49 = arith.constant 0 : index
    %c0_50 = arith.constant 0 : index
    %141 = vector.load %arg7[%c0_49, %c0_50] : memref<1x32xf32, #tpu.memory_space<vmem>>, vector<1x32xf32>
    %142 = vector.broadcast %141 : vector<1x32xf32> to vector<8x32xf32>
    %143 = arith.addf %140, %142 : vector<8x32xf32>
    %144 = arith.addf %1, %143 : vector<8x32xf32>
    %c0_51 = arith.constant 0 : index
    %c0_52 = arith.constant 0 : index
    %145 = vector.load %arg8[%c0_51, %c0_52] : memref<1x32xf32, #tpu.memory_space<vmem>>, vector<1x32xf32>
    %c0_53 = arith.constant 0 : index
    %c0_54 = arith.constant 0 : index
    %146 = vector.load %arg9[%c0_53, %c0_54] : memref<1x32xf32, #tpu.memory_space<vmem>>, vector<1x32xf32>
    %cst_55 = arith.constant dense<0.000000e+00> : vector<8xf32>
    %147 = vector.multi_reduction <add>, %144, %cst_55 [1] : vector<8x32xf32> to vector<8xf32>
    %148 = vector.shape_cast %147 : vector<8xf32> to vector<8x1xf32>
    %cst_56 = arith.constant 3.200000e+01 : f32
    %149 = vector.broadcast %cst_56 : f32 to vector<8x1xf32>
    %150 = arith.divf %148, %149 : vector<8x1xf32>
    %151 = vector.broadcast %150 : vector<8x1xf32> to vector<8x32xf32>
    %152 = arith.subf %144, %151 : vector<8x32xf32>
    %153 = arith.mulf %152, %152 : vector<8x32xf32>
    %cst_57 = arith.constant dense<0.000000e+00> : vector<8xf32>
    %154 = vector.multi_reduction <add>, %153, %cst_57 [1] : vector<8x32xf32> to vector<8xf32>
    %155 = vector.shape_cast %154 : vector<8xf32> to vector<8x1xf32>
    %cst_58 = arith.constant 3.200000e+01 : f32
    %156 = vector.broadcast %cst_58 : f32 to vector<8x1xf32>
    %157 = arith.divf %155, %156 : vector<8x1xf32>
    %cst_59 = arith.constant 9.99999974E-6 : f32
    %158 = vector.broadcast %cst_59 : f32 to vector<8x1xf32>
    %159 = arith.addf %157, %158 : vector<8x1xf32>
    %160 = math.rsqrt %159 : vector<8x1xf32>
    %161 = vector.broadcast %160 : vector<8x1xf32> to vector<8x32xf32>
    %162 = arith.mulf %152, %161 : vector<8x32xf32>
    %163 = vector.broadcast %145 : vector<1x32xf32> to vector<8x32xf32>
    %164 = arith.mulf %162, %163 : vector<8x32xf32>
    %165 = vector.broadcast %146 : vector<1x32xf32> to vector<8x32xf32>
    %166 = arith.addf %164, %165 : vector<8x32xf32>
    %167 = arith.truncf %166 : vector<8x32xf32> to vector<8x32xbf16>
    %c0_60 = arith.constant 0 : index
    %c0_61 = arith.constant 0 : index
    %168 = vector.load %arg10[%c0_60, %c0_61] : memref<32x64xbf16, #tpu.memory_space<vmem>>, vector<32x64xbf16>
    %cst_62 = arith.constant dense<0.000000e+00> : vector<8x64xf32>
    %169 = tpu.matmul %167, %168, %cst_62 {dimension_numbers = #tpu.dot_dimension_numbers<[1], [0], [0], [1], [0, 0, 1, 1], [], []>} : vector<8x32xbf16>, vector<32x64xbf16>, vector<8x64xf32> -> vector<8x64xf32>
    %c0_63 = arith.constant 0 : index
    %c0_64 = arith.constant 0 : index
    %170 = vector.load %arg11[%c0_63, %c0_64] : memref<1x64xf32, #tpu.memory_space<vmem>>, vector<1x64xf32>
    %171 = vector.broadcast %170 : vector<1x64xf32> to vector<8x64xf32>
    %172 = arith.addf %169, %171 : vector<8x64xf32>
    %cst_65 = arith.constant 0.000000e+00 : f32
    %173 = vector.broadcast %cst_65 : f32 to vector<8x64xf32>
    %174 = arith.maximumf %172, %173 : vector<8x64xf32>
    %175 = arith.truncf %174 : vector<8x64xf32> to vector<8x64xbf16>
    %c0_66 = arith.constant 0 : index
    %c0_67 = arith.constant 0 : index
    %176 = vector.load %arg12[%c0_66, %c0_67] : memref<64x32xbf16, #tpu.memory_space<vmem>>, vector<64x32xbf16>
    %cst_68 = arith.constant dense<0.000000e+00> : vector<8x32xf32>
    %177 = tpu.matmul %175, %176, %cst_68 {dimension_numbers = #tpu.dot_dimension_numbers<[1], [0], [0], [1], [0, 0, 1, 1], [], []>} : vector<8x64xbf16>, vector<64x32xbf16>, vector<8x32xf32> -> vector<8x32xf32>
    %c0_69 = arith.constant 0 : index
    %c0_70 = arith.constant 0 : index
    %178 = vector.load %arg13[%c0_69, %c0_70] : memref<1x32xf32, #tpu.memory_space<vmem>>, vector<1x32xf32>
    %179 = vector.broadcast %178 : vector<1x32xf32> to vector<8x32xf32>
    %180 = arith.addf %177, %179 : vector<8x32xf32>
    %181 = arith.addf %144, %180 : vector<8x32xf32>
    %182 = vector.shape_cast %181 : vector<8x32xf32> to vector<1x8x32xf32>
    %c0_71 = arith.constant 0 : index
    %c0_72 = arith.constant 0 : index
    %c0_73 = arith.constant 0 : index
    %183 = vector.load %arg14[%c0_71, %c0_72, %c0_73] : memref<1x8x32xf32, #tpu.memory_space<vmem>>, vector<1x8x32xf32>
    tpu.vector_store %arg14[%c0_71, %c0_72, %c0_73], %182 {strides = array<i32>} : memref<1x8x32xf32, #tpu.memory_space<vmem>>, vector<1x8x32xf32>,
    return
  }
  func.func @transform_0(%arg0: i32) -> (i32, i32, i32) {
    %c0_i32 = arith.constant 0 : i32
    %c0_i32_0 = arith.constant 0 : i32
    %c0_i32_1 = arith.constant 0 : i32
    return %arg0, %c0_i32, %c0_i32_0 : i32, i32, i32
  }
  func.func @transform_1(%arg0: i32) -> (i32, i32) {
    %c0_i32 = arith.constant 0 : i32
    %c0_i32_0 = arith.constant 0 : i32
    %c0_i32_1 = arith.constant 0 : i32
    return %c0_i32, %c0_i32_0 : i32, i32
  }
  func.func @transform_2(%arg0: i32) -> (i32, i32) {
    %c0_i32 = arith.constant 0 : i32
    %c0_i32_0 = arith.constant 0 : i32
    %c0_i32_1 = arith.constant 0 : i32
    return %c0_i32, %c0_i32_0 : i32, i32
  }
  func.func @transform_3(%arg0: i32) -> (i32, i32) {
    %c0_i32 = arith.constant 0 : i32
    %c0_i32_0 = arith.constant 0 : i32
    %c0_i32_1 = arith.constant 0 : i32
    return %c0_i32, %c0_i32_0 : i32, i32
  }
  func.func @transform_4(%arg0: i32) -> (i32, i32) {
    %c0_i32 = arith.constant 0 : i32
    %c0_i32_0 = arith.constant 0 : i32
    %c0_i32_1 = arith.constant 0 : i32
    return %c0_i32, %c0_i32_0 : i32, i32
  }
  func.func @transform_5(%arg0: i32) -> (i32, i32) {
    %c0_i32 = arith.constant 0 : i32
    %c0_i32_0 = arith.constant 0 : i32
    %c0_i32_1 = arith.constant 0 : i32
    return %c0_i32, %c0_i32_0 : i32, i32
  }
  func.func @transform_6(%arg0: i32) -> (i32, i32) {
    %c0_i32 = arith.constant 0 : i32
    %c0_i32_0 = arith.constant 0 : i32
    %c0_i32_1 = arith.constant 0 : i32
    return %c0_i32, %c0_i32_0 : i32, i32
  }
  func.func @transform_7(%arg0: i32) -> (i32, i32) {
    %c0_i32 = arith.constant 0 : i32
    %c0_i32_0 = arith.constant 0 : i32
    %c0_i32_1 = arith.constant 0 : i32
    return %c0_i32, %c0_i32_0 : i32, i32
  }
  func.func @transform_8(%arg0: i32) -> (i32, i32) {
    %c0_i32 = arith.constant 0 : i32
    %c0_i32_0 = arith.constant 0 : i32
    %c0_i32_1 = arith.constant 0 : i32
    return %c0_i32, %c0_i32_0 : i32, i32
  }
  func.func @transform_9(%arg0: i32) -> (i32, i32) {
    %c0_i32 = arith.constant 0 : i32
    %c0_i32_0 = arith.constant 0 : i32
    %c0_i32_1 = arith.constant 0 : i32
    return %c0_i32, %c0_i32_0 : i32, i32
  }
  func.func @transform_10(%arg0: i32) -> (i32, i32) {
    %c0_i32 = arith.constant 0 : i32
    %c0_i32_0 = arith.constant 0 : i32
    %c0_i32_1 = arith.constant 0 : i32
    return %c0_i32, %c0_i32_0 : i32, i32
  }
  func.func @transform_11(%arg0: i32) -> (i32, i32) {
    %c0_i32 = arith.constant 0 : i32
    %c0_i32_0 = arith.constant 0 : i32
    %c0_i32_1 = arith.constant 0 : i32
    return %c0_i32, %c0_i32_0 : i32, i32
  }
  func.func @transform_12(%arg0: i32) -> (i32, i32) {
    %c0_i32 = arith.constant 0 : i32
    %c0_i32_0 = arith.constant 0 : i32
    %c0_i32_1 = arith.constant 0 : i32
    return %c0_i32, %c0_i32_0 : i32, i32
  }
  func.func @transform_13(%arg0: i32) -> (i32, i32, i32) {
    %c0_i32 = arith.constant 0 : i32
    %c0_i32_0 = arith.constant 0 : i32
    %c0_i32_1 = arith.constant 0 : i32
    return %arg0, %c0_i32, %c0_i32_0 : i32, i32, i32
  }
}

module attributes {stable_mosaic.version = 11 : i64} {
  func.func @kernel(%arg0: i32, %arg1: memref<1x8x32xf32, #tpu.memory_space<vmem>>, %arg2: memref<1x32xf32, #tpu.memory_space<vmem>>, %arg3: memref<1x32xf32, #tpu.memory_space<vmem>>, %arg4: memref<32x96xbf16, #tpu.memory_space<vmem>>, %arg5: memref<1x96xf32, #tpu.memory_space<vmem>>, %arg6: memref<32x32xbf16, #tpu.memory_space<vmem>>, %arg7: memref<1x32xf32, #tpu.memory_space<vmem>>, %arg8: memref<1x32xf32, #tpu.memory_space<vmem>>, %arg9: memref<1x32xf32, #tpu.memory_space<vmem>>, %arg10: memref<32x64xbf16, #tpu.memory_space<vmem>>, %arg11: memref<1x64xf32, #tpu.memory_space<vmem>>, %arg12: memref<64x32xbf16, #tpu.memory_space<vmem>>, %arg13: memref<1x32xf32, #tpu.memory_space<vmem>>, %arg14: memref<1x8x32xf32, #tpu.memory_space<vmem>>, %arg15: memref<8x32xbf16, #tpu.memory_space<vmem>>) attributes {dimension_semantics = [#tpu.dimension_semantics<parallel>], iteration_bounds = array<i64: 2>, scalar_prefetch = 0 : i64, scratch_operands = 1 : i64, tpu.core_type = #tpu.core_type<tc>, window_params = [{transform_indices = @transform_0, window_bounds = array<i64: 1, 8, 32>}, {pipeline_mode = #tpu.pipeline_mode<synchronous>, transform_indices = @transform_1, window_bounds = array<i64: 1, 32>}, {pipeline_mode = #tpu.pipeline_mode<synchronous>, transform_indices = @transform_2, window_bounds = array<i64: 1, 32>}, {pipeline_mode = #tpu.pipeline_mode<synchronous>, transform_indices = @transform_3, window_bounds = array<i64: 32, 96>}, {pipeline_mode = #tpu.pipeline_mode<synchronous>, transform_indices = @transform_4, window_bounds = array<i64: 1, 96>}, {pipeline_mode = #tpu.pipeline_mode<synchronous>, transform_indices = @transform_5, window_bounds = array<i64: 32, 32>}, {pipeline_mode = #tpu.pipeline_mode<synchronous>, transform_indices = @transform_6, window_bounds = array<i64: 1, 32>}, {pipeline_mode = #tpu.pipeline_mode<synchronous>, transform_indices = @transform_7, window_bounds = array<i64: 1, 32>}, {pipeline_mode = #tpu.pipeline_mode<synchronous>, transform_indices = @transform_8, window_bounds = array<i64: 1, 32>}, {pipeline_mode = #tpu.pipeline_mode<synchronous>, transform_indices = @transform_9, window_bounds = array<i64: 32, 64>}, {pipeline_mode = #tpu.pipeline_mode<synchronous>, transform_indices = @transform_10, window_bounds = array<i64: 1, 64>}, {pipeline_mode = #tpu.pipeline_mode<synchronous>, transform_indices = @transform_11, window_bounds = array<i64: 64, 32>}, {pipeline_mode = #tpu.pipeline_mode<synchronous>, transform_indices = @transform_12, window_bounds = array<i64: 1, 32>}, {transform_indices = @transform_13, window_bounds = array<i64: 1, 8, 32>}]} {
    %c0 = arith.constant 0 : index
    %c0_0 = arith.constant 0 : index
    %c0_1 = arith.constant 0 : index
    %0 = vector.load %arg1[%c0, %c0_0, %c0_1] : memref<1x8x32xf32, #tpu.memory_space<vmem>>, vector<1x8x32xf32>
    %1 = vector.shape_cast %0 : vector<1x8x32xf32> to vector<8x32xf32>
    %c0_2 = arith.constant 0 : index
    %c0_3 = arith.constant 0 : index
    %2 = vector.load %arg2[%c0_2, %c0_3] : memref<1x32xf32, #tpu.memory_space<vmem>>, vector<1x32xf32>
    %c0_4 = arith.constant 0 : index
    %c0_5 = arith.constant 0 : index
    %3 = vector.load %arg3[%c0_4, %c0_5] : memref<1x32xf32, #tpu.memory_space<vmem>>, vector<1x32xf32>
    %cst = arith.constant dense<0.000000e+00> : vector<8xf32>
    %4 = vector.multi_reduction <add>, %1, %cst [1] : vector<8x32xf32> to vector<8xf32>
    %5 = vector.shape_cast %4 : vector<8xf32> to vector<8x1xf32>
    %cst_6 = arith.constant 3.200000e+01 : f32
    %6 = vector.broadcast %cst_6 : f32 to vector<8x1xf32>
    %7 = arith.divf %5, %6 : vector<8x1xf32>
    %8 = vector.broadcast %7 : vector<8x1xf32> to vector<8x32xf32>
    %9 = arith.subf %1, %8 : vector<8x32xf32>
    %10 = arith.mulf %9, %9 : vector<8x32xf32>
    %cst_7 = arith.constant dense<0.000000e+00> : vector<8xf32>
    %11 = vector.multi_reduction <add>, %10, %cst_7 [1] : vector<8x32xf32> to vector<8xf32>
    %12 = vector.shape_cast %11 : vector<8xf32> to vector<8x1xf32>
    %cst_8 = arith.constant 3.200000e+01 : f32
    %13 = vector.broadcast %cst_8 : f32 to vector<8x1xf32>
    %14 = arith.divf %12, %13 : vector<8x1xf32>
    %cst_9 = arith.constant 9.99999974E-6 : f32
    %15 = vector.broadcast %cst_9 : f32 to vector<8x1xf32>
    %16 = arith.addf %14, %15 : vector<8x1xf32>
    %17 = math.rsqrt %16 : vector<8x1xf32>
    %18 = vector.broadcast %17 : vector<8x1xf32> to vector<8x32xf32>
    %19 = arith.mulf %9, %18 : vector<8x32xf32>
    %20 = vector.broadcast %2 : vector<1x32xf32> to vector<8x32xf32>
    %21 = arith.mulf %19, %20 : vector<8x32xf32>
    %22 = vector.broadcast %3 : vector<1x32xf32> to vector<8x32xf32>
    %23 = arith.addf %21, %22 : vector<8x32xf32>
    %24 = arith.truncf %23 : vector<8x32xf32> to vector<8x32xbf16>
    %c0_10 = arith.constant 0 : index
    %c0_11 = arith.constant 0 : index
    %25 = vector.load %arg4[%c0_10, %c0_11] : memref<32x96xbf16, #tpu.memory_space<vmem>>, vector<32x96xbf16>
    %cst_12 = arith.constant dense<0.000000e+00> : vector<8x96xf32>
    %26 = tpu.matmul %24, %25, %cst_12 {dimension_numbers = #tpu.dot_dimension_numbers<[1], [0], [0], [1], [0, 0, 1, 1], [], []>} : vector<8x32xbf16>, vector<32x96xbf16>, vector<8x96xf32> -> vector<8x96xf32>
    %c0_13 = arith.constant 0 : index
    %c0_14 = arith.constant 0 : index
    %27 = vector.load %arg5[%c0_13, %c0_14] : memref<1x96xf32, #tpu.memory_space<vmem>>, vector<1x96xf32>
    %28 = vector.broadcast %27 : vector<1x96xf32> to vector<8x96xf32>
    %29 = arith.addf %26, %28 : vector<8x96xf32>
    %30 = vector.shape_cast %29 : vector<8x96xf32> to vector<1x8x96xf32>
    %31 = tpu.iota {dimensions = array<i32: 1>} : vector<1x8x8xi32>
    %32 = tpu.iota {dimensions = array<i32: 2>} : vector<1x8x8xi32>
    %33 = arith.cmpi sle, %32, %31 : vector<1x8x8xi32>
    %34 = vector.extract_strided_slice %30 {offsets = [0, 0, 0], sizes = [1, 8, 8], strides = [1, 1, 1]} : vector<1x8x96xf32> to vector<1x8x8xf32>
    %cst_15 = arith.constant 0.353553385 : f32
    %35 = vector.broadcast %cst_15 : f32 to vector<1x8x8xf32>
    %36 = arith.mulf %34, %35 : vector<1x8x8xf32>
    %37 = arith.truncf %36 : vector<1x8x8xf32> to vector<1x8x8xbf16>
    %38 = vector.extract_strided_slice %30 {offsets = [0, 0, 8], sizes = [1, 8, 8], strides = [1, 1, 1]} : vector<1x8x96xf32> to vector<1x8x8xf32>
    %39 = arith.truncf %38 : vector<1x8x8xf32> to vector<1x8x8xbf16>
    %40 = vector.extract_strided_slice %30 {offsets = [0, 0, 16], sizes = [1, 8, 8], strides = [1, 1, 1]} : vector<1x8x96xf32> to vector<1x8x8xf32>
    %41 = arith.truncf %40 : vector<1x8x8xf32> to vector<1x8x8xbf16>
    "tpu.trace_start"() <{level = 10 : i32, message = "bqd,bkd->bqk"}> : () -> ()
    %cst_16 = arith.constant dense<0.000000e+00> : vector<1x8x8xf32>
    %42 = tpu.matmul %37, %39, %cst_16 {dimension_numbers = #tpu.dot_dimension_numbers<[2], [2], [1], [1], [0, 0, 0, 1, 1, 1], [0], [0]>} : vector<1x8x8xbf16>, vector<1x8x8xbf16>, vector<1x8x8xf32> -> vector<1x8x8xf32>
    %cst_17 = arith.constant -1.000000e+09 : f32
    "tpu.trace_stop"() : () -> ()
    %43 = vector.broadcast %cst_17 : f32 to vector<1x8x8xf32>
    %44 = arith.select %33, %42, %43 : vector<1x8x8xi1>, vector<1x8x8xf32>
    %cst_18 = arith.constant dense<0xFF800000> : vector<1x8xf32>
    %45 = vector.multi_reduction <maximumf>, %44, %cst_18 [2] : vector<1x8x8xf32> to vector<1x8xf32>
    %46 = vector.shape_cast %45 : vector<1x8xf32> to vector<1x8x1xf32>
    %47 = vector.broadcast %46 : vector<1x8x1xf32> to vector<1x8x8xf32>
    %48 = arith.subf %44, %47 : vector<1x8x8xf32>
    %49 = math.exp %48 : vector<1x8x8xf32>
    %cst_19 = arith.constant dense<0.000000e+00> : vector<1x8xf32>
    %50 = vector.multi_reduction <add>, %49, %cst_19 [2] : vector<1x8x8xf32> to vector<1x8xf32>
    %51 = vector.shape_cast %50 : vector<1x8xf32> to vector<1x8x1xf32>
    %52 = tpu.reciprocal %51 {approx = true} : vector<1x8x1xf32> -> vector<1x8x1xf32>
    %53 = vector.broadcast %52 : vector<1x8x1xf32> to vector<1x8x8xf32>
    %54 = arith.mulf %49, %53 : vector<1x8x8xf32>
    %55 = arith.truncf %54 : vector<1x8x8xf32> to vector<1x8x8xbf16>
    "tpu.trace_start"() <{level = 10 : i32, message = "bqk,bkd->bqd"}> : () -> ()
    %cst_20 = arith.constant dense<0.000000e+00> : vector<1x8x8xf32>
    %56 = tpu.matmul %55, %41, %cst_20 {dimension_numbers = #tpu.dot_dimension_numbers<[2], [1], [1], [2], [0, 0, 0, 1, 1, 2], [0], [0]>} : vector<1x8x8xbf16>, vector<1x8x8xbf16>, vector<1x8x8xf32> -> vector<1x8x8xf32>
    "tpu.trace_stop"() : () -> ()
    %57 = vector.shape_cast %56 : vector<1x8x8xf32> to vector<8x8xf32>
    %58 = arith.truncf %57 : vector<8x8xf32> to vector<8x8xbf16>
    %c0_21 = arith.constant 0 : index
    %c0_22 = arith.constant 0 : index
    %59 = vector.load %arg15[%c0_21, %c0_22] : memref<8x32xbf16, #tpu.memory_space<vmem>>, vector<8x8xbf16>
    tpu.vector_store %arg15[%c0_21, %c0_22], %58 {strides = array<i32>} : memref<8x32xbf16, #tpu.memory_space<vmem>>, vector<8x8xbf16>,
    %60 = vector.extract_strided_slice %30 {offsets = [0, 0, 24], sizes = [1, 8, 8], strides = [1, 1, 1]} : vector<1x8x96xf32> to vector<1x8x8xf32>
    %cst_23 = arith.constant 0.353553385 : f32
    %61 = vector.broadcast %cst_23 : f32 to vector<1x8x8xf32>
    %62 = arith.mulf %60, %61 : vector<1x8x8xf32>
    %63 = arith.truncf %62 : vector<1x8x8xf32> to vector<1x8x8xbf16>
    %64 = vector.extract_strided_slice %30 {offsets = [0, 0, 32], sizes = [1, 8, 8], strides = [1, 1, 1]} : vector<1x8x96xf32> to vector<1x8x8xf32>
    %65 = arith.truncf %64 : vector<1x8x8xf32> to vector<1x8x8xbf16>
    %66 = vector.extract_strided_slice %30 {offsets = [0, 0, 40], sizes = [1, 8, 8], strides = [1, 1, 1]} : vector<1x8x96xf32> to vector<1x8x8xf32>
    %67 = arith.truncf %66 : vector<1x8x8xf32> to vector<1x8x8xbf16>
    "tpu.trace_start"() <{level = 10 : i32, message = "bqd,bkd->bqk"}> : () -> ()
    %cst_24 = arith.constant dense<0.000000e+00> : vector<1x8x8xf32>
    %68 = tpu.matmul %63, %65, %cst_24 {dimension_numbers = #tpu.dot_dimension_numbers<[2], [2], [1], [1], [0, 0, 0, 1, 1, 1], [0], [0]>} : vector<1x8x8xbf16>, vector<1x8x8xbf16>, vector<1x8x8xf32> -> vector<1x8x8xf32>
    %cst_25 = arith.constant -1.000000e+09 : f32
    "tpu.trace_stop"() : () -> ()
    %69 = vector.broadcast %cst_25 : f32 to vector<1x8x8xf32>
    %70 = arith.select %33, %68, %69 : vector<1x8x8xi1>, vector<1x8x8xf32>
    %cst_26 = arith.constant dense<0xFF800000> : vector<1x8xf32>
    %71 = vector.multi_reduction <maximumf>, %70, %cst_26 [2] : vector<1x8x8xf32> to vector<1x8xf32>
    %72 = vector.shape_cast %71 : vector<1x8xf32> to vector<1x8x1xf32>
    %73 = vector.broadcast %72 : vector<1x8x1xf32> to vector<1x8x8xf32>
    %74 = arith.subf %70, %73 : vector<1x8x8xf32>
    %75 = math.exp %74 : vector<1x8x8xf32>
    %cst_27 = arith.constant dense<0.000000e+00> : vector<1x8xf32>
    %76 = vector.multi_reduction <add>, %75, %cst_27 [2] : vector<1x8x8xf32> to vector<1x8xf32>
    %77 = vector.shape_cast %76 : vector<1x8xf32> to vector<1x8x1xf32>
    %78 = tpu.reciprocal %77 {approx = true} : vector<1x8x1xf32> -> vector<1x8x1xf32>
    %79 = vector.broadcast %78 : vector<1x8x1xf32> to vector<1x8x8xf32>
    %80 = arith.mulf %75, %79 : vector<1x8x8xf32>
    %81 = arith.truncf %80 : vector<1x8x8xf32> to vector<1x8x8xbf16>
    "tpu.trace_start"() <{level = 10 : i32, message = "bqk,bkd->bqd"}> : () -> ()
    %cst_28 = arith.constant dense<0.000000e+00> : vector<1x8x8xf32>
    %82 = tpu.matmul %81, %67, %cst_28 {dimension_numbers = #tpu.dot_dimension_numbers<[2], [1], [1], [2], [0, 0, 0, 1, 1, 2], [0], [0]>} : vector<1x8x8xbf16>, vector<1x8x8xbf16>, vector<1x8x8xf32> -> vector<1x8x8xf32>
    "tpu.trace_stop"() : () -> ()
    %83 = vector.shape_cast %82 : vector<1x8x8xf32> to vector<8x8xf32>
    %84 = arith.truncf %83 : vector<8x8xf32> to vector<8x8xbf16>
    %c0_29 = arith.constant 0 : index
    %c8 = arith.constant 8 : index
    %85 = vector.load %arg15[%c0_29, %c8] : memref<8x32xbf16, #tpu.memory_space<vmem>>, vector<8x8xbf16>
    tpu.vector_store %arg15[%c0_29, %c8], %84 {strides = array<i32>} : memref<8x32xbf16, #tpu.memory_space<vmem>>, vector<8x8xbf16>,
    %86 = vector.extract_strided_slice %30 {offsets = [0, 0, 48], sizes = [1, 8, 8], strides = [1, 1, 1]} : vector<1x8x96xf32> to vector<1x8x8xf32>
    %cst_30 = arith.constant 0.353553385 : f32
    %87 = vector.broadcast %cst_30 : f32 to vector<1x8x8xf32>
    %88 = arith.mulf %86, %87 : vector<1x8x8xf32>
    %89 = arith.truncf %88 : vector<1x8x8xf32> to vector<1x8x8xbf16>
    %90 = vector.extract_strided_slice %30 {offsets = [0, 0, 56], sizes = [1, 8, 8], strides = [1, 1, 1]} : vector<1x8x96xf32> to vector<1x8x8xf32>
    %91 = arith.truncf %90 : vector<1x8x8xf32> to vector<1x8x8xbf16>
    %92 = vector.extract_strided_slice %30 {offsets = [0, 0, 64], sizes = [1, 8, 8], strides = [1, 1, 1]} : vector<1x8x96xf32> to vector<1x8x8xf32>
    %93 = arith.truncf %92 : vector<1x8x8xf32> to vector<1x8x8xbf16>
    "tpu.trace_start"() <{level = 10 : i32, message = "bqd,bkd->bqk"}> : () -> ()
    %cst_31 = arith.constant dense<0.000000e+00> : vector<1x8x8xf32>
    %94 = tpu.matmul %89, %91, %cst_31 {dimension_numbers = #tpu.dot_dimension_numbers<[2], [2], [1], [1], [0, 0, 0, 1, 1, 1], [0], [0]>} : vector<1x8x8xbf16>, vector<1x8x8xbf16>, vector<1x8x8xf32> -> vector<1x8x8xf32>
    %cst_32 = arith.constant -1.000000e+09 : f32
    "tpu.trace_stop"() : () -> ()
    %95 = vector.broadcast %cst_32 : f32 to vector<1x8x8xf32>
    %96 = arith.select %33, %94, %95 : vector<1x8x8xi1>, vector<1x8x8xf32>
    %cst_33 = arith.constant dense<0xFF800000> : vector<1x8xf32>
    %97 = vector.multi_reduction <maximumf>, %96, %cst_33 [2] : vector<1x8x8xf32> to vector<1x8xf32>
    %98 = vector.shape_cast %97 : vector<1x8xf32> to vector<1x8x1xf32>
    %99 = vector.broadcast %98 : vector<1x8x1xf32> to vector<1x8x8xf32>
    %100 = arith.subf %96, %99 : vector<1x8x8xf32>
    %101 = math.exp %100 : vector<1x8x8xf32>
    %cst_34 = arith.constant dense<0.000000e+00> : vector<1x8xf32>
    %102 = vector.multi_reduction <add>, %101, %cst_34 [2] : vector<1x8x8xf32> to vector<1x8xf32>
    %103 = vector.shape_cast %102 : vector<1x8xf32> to vector<1x8x1xf32>
    %104 = tpu.reciprocal %103 {approx = true} : vector<1x8x1xf32> -> vector<1x8x1xf32>
    %105 = vector.broadcast %104 : vector<1x8x1xf32> to vector<1x8x8xf32>
    %106 = arith.mulf %101, %105 : vector<1x8x8xf32>
    %107 = arith.truncf %106 : vector<1x8x8xf32> to vector<1x8x8xbf16>
    "tpu.trace_start"() <{level = 10 : i32, message = "bqk,bkd->bqd"}> : () -> ()
    %cst_35 = arith.constant dense<0.000000e+00> : vector<1x8x8xf32>
    %108 = tpu.matmul %107, %93, %cst_35 {dimension_numbers = #tpu.dot_dimension_numbers<[2], [1], [1], [2], [0, 0, 0, 1, 1, 2], [0], [0]>} : vector<1x8x8xbf16>, vector<1x8x8xbf16>, vector<1x8x8xf32> -> vector<1x8x8xf32>
    "tpu.trace_stop"() : () -> ()
    %109 = vector.shape_cast %108 : vector<1x8x8xf32> to vector<8x8xf32>
    %110 = arith.truncf %109 : vector<8x8xf32> to vector<8x8xbf16>
    %c0_36 = arith.constant 0 : index
    %c16 = arith.constant 16 : index
    %111 = vector.load %arg15[%c0_36, %c16] : memref<8x32xbf16, #tpu.memory_space<vmem>>, vector<8x8xbf16>
    tpu.vector_store %arg15[%c0_36, %c16], %110 {strides = array<i32>} : memref<8x32xbf16, #tpu.memory_space<vmem>>, vector<8x8xbf16>,
    %112 = vector.extract_strided_slice %30 {offsets = [0, 0, 72], sizes = [1, 8, 8], strides = [1, 1, 1]} : vector<1x8x96xf32> to vector<1x8x8xf32>
    %cst_37 = arith.constant 0.353553385 : f32
    %113 = vector.broadcast %cst_37 : f32 to vector<1x8x8xf32>
    %114 = arith.mulf %112, %113 : vector<1x8x8xf32>
    %115 = arith.truncf %114 : vector<1x8x8xf32> to vector<1x8x8xbf16>
    %116 = vector.extract_strided_slice %30 {offsets = [0, 0, 80], sizes = [1, 8, 8], strides = [1, 1, 1]} : vector<1x8x96xf32> to vector<1x8x8xf32>
    %117 = arith.truncf %116 : vector<1x8x8xf32> to vector<1x8x8xbf16>
    %118 = vector.extract_strided_slice %30 {offsets = [0, 0, 88], sizes = [1, 8, 8], strides = [1, 1, 1]} : vector<1x8x96xf32> to vector<1x8x8xf32>
    %119 = arith.truncf %118 : vector<1x8x8xf32> to vector<1x8x8xbf16>
    "tpu.trace_start"() <{level = 10 : i32, message = "bqd,bkd->bqk"}> : () -> ()
    %cst_38 = arith.constant dense<0.000000e+00> : vector<1x8x8xf32>
    %120 = tpu.matmul %115, %117, %cst_38 {dimension_numbers = #tpu.dot_dimension_numbers<[2], [2], [1], [1], [0, 0, 0, 1, 1, 1], [0], [0]>} : vector<1x8x8xbf16>, vector<1x8x8xbf16>, vector<1x8x8xf32> -> vector<1x8x8xf32>
    %cst_39 = arith.constant -1.000000e+09 : f32
    "tpu.trace_stop"() : () -> ()
    %121 = vector.broadcast %cst_39 : f32 to vector<1x8x8xf32>
    %122 = arith.select %33, %120, %121 : vector<1x8x8xi1>, vector<1x8x8xf32>
    %cst_40 = arith.constant dense<0xFF800000> : vector<1x8xf32>
    %123 = vector.multi_reduction <maximumf>, %122, %cst_40 [2] : vector<1x8x8xf32> to vector<1x8xf32>
    %124 = vector.shape_cast %123 : vector<1x8xf32> to vector<1x8x1xf32>
    %125 = vector.broadcast %124 : vector<1x8x1xf32> to vector<1x8x8xf32>
    %126 = arith.subf %122, %125 : vector<1x8x8xf32>
    %127 = math.exp %126 : vector<1x8x8xf32>
    %cst_41 = arith.constant dense<0.000000e+00> : vector<1x8xf32>
    %128 = vector.multi_reduction <add>, %127, %cst_41 [2] : vector<1x8x8xf32> to vector<1x8xf32>
    %129 = vector.shape_cast %128 : vector<1x8xf32> to vector<1x8x1xf32>
    %130 = tpu.reciprocal %129 {approx = true} : vector<1x8x1xf32> -> vector<1x8x1xf32>
    %131 = vector.broadcast %130 : vector<1x8x1xf32> to vector<1x8x8xf32>
    %132 = arith.mulf %127, %131 : vector<1x8x8xf32>
    %133 = arith.truncf %132 : vector<1x8x8xf32> to vector<1x8x8xbf16>
    "tpu.trace_start"() <{level = 10 : i32, message = "bqk,bkd->bqd"}> : () -> ()
    %cst_42 = arith.constant dense<0.000000e+00> : vector<1x8x8xf32>
    %134 = tpu.matmul %133, %119, %cst_42 {dimension_numbers = #tpu.dot_dimension_numbers<[2], [1], [1], [2], [0, 0, 0, 1, 1, 2], [0], [0]>} : vector<1x8x8xbf16>, vector<1x8x8xbf16>, vector<1x8x8xf32> -> vector<1x8x8xf32>
    "tpu.trace_stop"() : () -> ()
    %135 = vector.shape_cast %134 : vector<1x8x8xf32> to vector<8x8xf32>
    %136 = arith.truncf %135 : vector<8x8xf32> to vector<8x8xbf16>
    %c0_43 = arith.constant 0 : index
    %c24 = arith.constant 24 : index
    %137 = vector.load %arg15[%c0_43, %c24] : memref<8x32xbf16, #tpu.memory_space<vmem>>, vector<8x8xbf16>
    tpu.vector_store %arg15[%c0_43, %c24], %136 {strides = array<i32>} : memref<8x32xbf16, #tpu.memory_space<vmem>>, vector<8x8xbf16>,
    %c0_44 = arith.constant 0 : index
    %c0_45 = arith.constant 0 : index
    %138 = vector.load %arg15[%c0_44, %c0_45] : memref<8x32xbf16, #tpu.memory_space<vmem>>, vector<8x32xbf16>
    %c0_46 = arith.constant 0 : index
    %c0_47 = arith.constant 0 : index
    %139 = vector.load %arg6[%c0_46, %c0_47] : memref<32x32xbf16, #tpu.memory_space<vmem>>, vector<32x32xbf16>
    %cst_48 = arith.constant dense<0.000000e+00> : vector<8x32xf32>
    %140 = tpu.matmul %138, %139, %cst_48 {dimension_numbers = #tpu.dot_dimension_numbers<[1], [0], [0], [1], [0, 0, 1, 1], [], []>} : vector<8x32xbf16>, vector<32x32xbf16>, vector<8x32xf32> -> vector<8x32xf32>
    %c0_49 = arith.constant 0 : index
    %c0_50 = arith.constant 0 : index
    %141 = vector.load %arg7[%c0_49, %c0_50] : memref<1x32xf32, #tpu.memory_space<vmem>>, vector<1x32xf32>
    %142 = vector.broadcast %141 : vector<1x32xf32> to vector<8x32xf32>
    %143 = arith.addf %140, %142 : vector<8x32xf32>
    %144 = arith.addf %1, %143 : vector<8x32xf32>
    %c0_51 = arith.constant 0 : index
    %c0_52 = arith.constant 0 : index
    %145 = vector.load %arg8[%c0_51, %c0_52] : memref<1x32xf32, #tpu.memory_space<vmem>>, vector<1x32xf32>
    %c0_53 = arith.constant 0 : index
    %c0_54 = arith.constant 0 : index
    %146 = vector.load %arg9[%c0_53, %c0_54] : memref<1x32xf32, #tpu.memory_space<vmem>>, vector<1x32xf32>
    %cst_55 = arith.constant dense<0.000000e+00> : vector<8xf32>
    %147 = vector.multi_reduction <add>, %144, %cst_55 [1] : vector<8x32xf32> to vector<8xf32>
    %148 = vector.shape_cast %147 : vector<8xf32> to vector<8x1xf32>
    %cst_56 = arith.constant 3.200000e+01 : f32
    %149 = vector.broadcast %cst_56 : f32 to vector<8x1xf32>
    %150 = arith.divf %148, %149 : vector<8x1xf32>
    %151 = vector.broadcast %150 : vector<8x1xf32> to vector<8x32xf32>
    %152 = arith.subf %144, %151 : vector<8x32xf32>
    %153 = arith.mulf %152, %152 : vector<8x32xf32>
    %cst_57 = arith.constant dense<0.000000e+00> : vector<8xf32>
    %154 = vector.multi_reduction <add>, %153, %cst_57 [1] : vector<8x32xf32> to vector<8xf32>
    %155 = vector.shape_cast %154 : vector<8xf32> to vector<8x1xf32>
    %cst_58 = arith.constant 3.200000e+01 : f32
    %156 = vector.broadcast %cst_58 : f32 to vector<8x1xf32>
    %157 = arith.divf %155, %156 : vector<8x1xf32>
    %cst_59 = arith.constant 9.99999974E-6 : f32
    %158 = vector.broadcast %cst_59 : f32 to vector<8x1xf32>
    %159 = arith.addf %157, %158 : vector<8x1xf32>
    %160 = math.rsqrt %159 : vector<8x1xf32>
    %161 = vector.broadcast %160 : vector<8x1xf32> to vector<8x32xf32>
    %162 = arith.mulf %152, %161 : vector<8x32xf32>
    %163 = vector.broadcast %145 : vector<1x32xf32> to vector<8x32xf32>
    %164 = arith.mulf %162, %163 : vector<8x32xf32>
    %165 = vector.broadcast %146 : vector<1x32xf32> to vector<8x32xf32>
    %166 = arith.addf %164, %165 : vector<8x32xf32>
    %167 = arith.truncf %166 : vector<8x32xf32> to vector<8x32xbf16>
    %c0_60 = arith.constant 0 : index
    %c0_61 = arith.constant 0 : index
    %168 = vector.load %arg10[%c0_60, %c0_61] : memref<32x64xbf16, #tpu.memory_space<vmem>>, vector<32x64xbf16>
    %cst_62 = arith.constant dense<0.000000e+00> : vector<8x64xf32>
    %169 = tpu.matmul %167, %168, %cst_62 {dimension_numbers = #tpu.dot_dimension_numbers<[1], [0], [0], [1], [0, 0, 1, 1], [], []>} : vector<8x32xbf16>, vector<32x64xbf16>, vector<8x64xf32> -> vector<8x64xf32>
    %c0_63 = arith.constant 0 : index
    %c0_64 = arith.constant 0 : index
    %170 = vector.load %arg11[%c0_63, %c0_64] : memref<1x64xf32, #tpu.memory_space<vmem>>, vector<1x64xf32>
    %171 = vector.broadcast %170 : vector<1x64xf32> to vector<8x64xf32>
    %172 = arith.addf %169, %171 : vector<8x64xf32>
    %cst_65 = arith.constant 0.000000e+00 : f32
    %173 = vector.broadcast %cst_65 : f32 to vector<8x64xf32>
    %174 = arith.maximumf %172, %173 : vector<8x64xf32>
    %175 = arith.truncf %174 : vector<8x64xf32> to vector<8x64xbf16>
    %c0_66 = arith.constant 0 : index
    %c0_67 = arith.constant 0 : index
    %176 = vector.load %arg12[%c0_66, %c0_67] : memref<64x32xbf16, #tpu.memory_space<vmem>>, vector<64x32xbf16>
    %cst_68 = arith.constant dense<0.000000e+00> : vector<8x32xf32>
    %177 = tpu.matmul %175, %176, %cst_68 {dimension_numbers = #tpu.dot_dimension_numbers<[1], [0], [0], [1], [0, 0, 1, 1], [], []>} : vector<8x64xbf16>, vector<64x32xbf16>, vector<8x32xf32> -> vector<8x32xf32>
    %c0_69 = arith.constant 0 : index
    %c0_70 = arith.constant 0 : index
    %178 = vector.load %arg13[%c0_69, %c0_70] : memref<1x32xf32, #tpu.memory_space<vmem>>, vector<1x32xf32>
    %179 = vector.broadcast %178 : vector<1x32xf32> to vector<8x32xf32>
    %180 = arith.addf %177, %179 : vector<8x32xf32>
    %181 = arith.addf %144, %180 : vector<8x32xf32>
    %182 = vector.shape_cast %181 : vector<8x32xf32> to vector<1x8x32xf32>
    %c0_71 = arith.constant 0 : index
    %c0_72 = arith.constant 0 : index
    %c0_73 = arith.constant 0 : index
    %183 = vector.load %arg14[%c0_71, %c0_72, %c0_73] : memref<1x8x32xf32, #tpu.memory_space<vmem>>, vector<1x8x32xf32>
    tpu.vector_store %arg14[%c0_71, %c0_72, %c0_73], %182 {strides = array<i32>} : memref<1x8x32xf32, #tpu.memory_space<vmem>>, vector<1x8x32xf32>,
    return
  }
  func.func @transform_0(%arg0: i32) -> (i32, i32, i32) {
    %c0_i32 = arith.constant 0 : i32
    %c0_i32_0 = arith.constant 0 : i32
    %c0_i32_1 = arith.constant 0 : i32
    return %arg0, %c0_i32, %c0_i32_0 : i32, i32, i32
  }
  func.func @transform_1(%arg0: i32) -> (i32, i32) {
    %c0_i32 = arith.constant 0 : i32
    %c0_i32_0 = arith.constant 0 : i32
    %c0_i32_1 = arith.constant 0 : i32
    return %c0_i32, %c0_i32_0 : i32, i32
  }
  func.func @transform_2(%arg0: i32) -> (i32, i32) {
    %c0_i32 = arith.constant 0 : i32
    %c0_i32_0 = arith.constant 0 : i32
    %c0_i32_1 = arith.constant 0 : i32
    return %c0_i32, %c0_i32_0 : i32, i32
  }
  func.func @transform_3(%arg0: i32) -> (i32, i32) {
    %c0_i32 = arith.constant 0 : i32
    %c0_i32_0 = arith.constant 0 : i32
    %c0_i32_1 = arith.constant 0 : i32
    return %c0_i32, %c0_i32_0 : i32, i32
  }
  func.func @transform_4(%arg0: i32) -> (i32, i32) {
    %c0_i32 = arith.constant 0 : i32
    %c0_i32_0 = arith.constant 0 : i32
    %c0_i32_1 = arith.constant 0 : i32
    return %c0_i32, %c0_i32_0 : i32, i32
  }
  func.func @transform_5(%arg0: i32) -> (i32, i32) {
    %c0_i32 = arith.constant 0 : i32
    %c0_i32_0 = arith.constant 0 : i32
    %c0_i32_1 = arith.constant 0 : i32
    return %c0_i32, %c0_i32_0 : i32, i32
  }
  func.func @transform_6(%arg0: i32) -> (i32, i32) {
    %c0_i32 = arith.constant 0 : i32
    %c0_i32_0 = arith.constant 0 : i32
    %c0_i32_1 = arith.constant 0 : i32
    return %c0_i32, %c0_i32_0 : i32, i32
  }
  func.func @transform_7(%arg0: i32) -> (i32, i32) {
    %c0_i32 = arith.constant 0 : i32
    %c0_i32_0 = arith.constant 0 : i32
    %c0_i32_1 = arith.constant 0 : i32
    return %c0_i32, %c0_i32_0 : i32, i32
  }
  func.func @transform_8(%arg0: i32) -> (i32, i32) {
    %c0_i32 = arith.constant 0 : i32
    %c0_i32_0 = arith.constant 0 : i32
    %c0_i32_1 = arith.constant 0 : i32
    return %c0_i32, %c0_i32_0 : i32, i32
  }
  func.func @transform_9(%arg0: i32) -> (i32, i32) {
    %c0_i32 = arith.constant 0 : i32
    %c0_i32_0 = arith.constant 0 : i32
    %c0_i32_1 = arith.constant 0 : i32
    return %c0_i32, %c0_i32_0 : i32, i32
  }
  func.func @transform_10(%arg0: i32) -> (i32, i32) {
    %c0_i32 = arith.constant 0 : i32
    %c0_i32_0 = arith.constant 0 : i32
    %c0_i32_1 = arith.constant 0 : i32
    return %c0_i32, %c0_i32_0 : i32, i32
  }
  func.func @transform_11(%arg0: i32) -> (i32, i32) {
    %c0_i32 = arith.constant 0 : i32
    %c0_i32_0 = arith.constant 0 : i32
    %c0_i32_1 = arith.constant 0 : i32
    return %c0_i32, %c0_i32_0 : i32, i32
  }
  func.func @transform_12(%arg0: i32) -> (i32, i32) {
    %c0_i32 = arith.constant 0 : i32
    %c0_i32_0 = arith.constant 0 : i32
    %c0_i32_1 = arith.constant 0 : i32
    return %c0_i32, %c0_i32_0 : i32, i32
  }
  func.func @transform_13(%arg0: i32) -> (i32, i32, i32) {
    %c0_i32 = arith.constant 0 : i32
    %c0_i32_0 = arith.constant 0 : i32
    %c0_i32_1 = arith.constant 0 : i32
    return %arg0, %c0_i32, %c0_i32_0 : i32, i32, i32
  }
}

</mosaic_0001>

<bundles_post_ra>
// kernel: tpu_custom_call.1
= control target key start
LH: loop header
LB: loop body
LE: loop exit
PB: predicated region body
PF: predicated region fallthrough
CT: control target
= control target key end

     0   :  { %s2304_s0 = inlined_call_operand.vmem [shape: f32[2,8,32], index: 0, kind: input, shape index: {}]   ;;  %s2305_s1 = inlined_call_operand.vmem [shape: f32[1,32], index: 1, kind: input, shape index: {}]   ;;  %s2306_s2 = inlined_call_operand.vmem [shape: f32[1,32], index: 2, kind: input, shape index: {}]   ;;  %s2307_s3 = inlined_call_operand.vmem [shape: bf16[32,96], index: 3, kind: input, shape index: {}]   ;;  %s2308_s4 = inlined_call_operand.vmem [shape: f32[1,96], index: 4, kind: input, shape index: {}]   ;;  %s2309_s5 = inlined_call_operand.vmem [shape: bf16[32,32], index: 5, kind: input, shape index: {}]   ;;  %s2310_s6 = inlined_call_operand.vmem [shape: f32[1,32], index: 6, kind: input, shape index: {}]   ;;  %s2311_s7 = inlined_call_operand.hbm [shape: f32[1,32], index: 7, kind: input, shape index: {}]   ;;  %s2312_s8 = inlined_call_operand.hbm [shape: f32[1,32], index: 8, kind: input, shape index: {}]   ;;  %s2313_s9 = inlined_call_operand.hbm [shape: bf16[32,64], index: 9, kind: input, shape index: {}]   ;;  %s2314_s10 = inlined_call_operand.hbm [shape: f32[1,64], index: 10, kind: input, shape index: {}]   ;;  %s2315_s11 = inlined_call_operand.vmem [shape: bf16[64,32], index: 11, kind: input, shape index: {}]   ;;  %s2316_s12 = inlined_call_operand.vmem [shape: f32[1,32], index: 12, kind: input, shape index: {}]   ;;  %s2317_s13 = inlined_call_operand.hbm [shape: f32[2,8,32], index: 13, kind: output, shape index: {}]  }
   0x1   :  { %2323 = sst [smem:[#allocation19_spill]] %s2311_s7 }
   0x2   :  { %18 = vsyncpa [#allocation4], 0 }
   0x3   :  { %19 = vsyncpa [#allocation7], 0 }
   0x4   :  { %20 = vsyncpa [#allocation10], 0 }
   0x5   :  { %21 = vsyncpa [#allocation5], 0 }
   0x6   :  { %23 = vsyncpa [#allocation5 + $0x1], 0  ;;  %s2005_s25 = smov 0   ;;  %s2007_s26 = smov 0  }
   0x7   :  { %s2009_s27 = smov 0   ;;  %s2011_s28 = smov 0  }
   0x8 LB: > { %2324 = sst [smem:[#allocation16_spill]] %s1906_s27  ;;  %s2026_s29 = sadd.s32 4294967295, %s1910_s28   ;;  %s1910_s28 = sphi %s2011_s28, %s2340_s28   ;;  %s1906_s27 = sphi %s2009_s27, %s2342_s27   ;;  %s1902_s26 = sphi %s2007_s26, %s2344_s26   ;;  %s1898_s25 = sphi %s2005_s25, %s2343_s25  }
   0x9   : > { %s1438_s30 = sadd.s32 4294967294, %s1910_s28   ;;  %s2030_s14 = sadd.s32 1, %s1910_s28  }
   0xa   : > { %2325 = sst [smem:[#allocation17_spill]] %s2030_s14  ;;  %s314_s15 = sadd.s32 1, %s1906_s27 }
   0xb   : > { %s311_s16 = ssub.s32 %s1910_s28, %s2030_s14  ;;  %p324_p0 = scmp.ne.s32.totalorder %s1906_s27, %s1902_s26 }
   0xc   : > { %p312_p1 = scmp.eq.s32.totalorder %s311_s16, 0  ;;  %p325_p2 = scmp.eq.s32.totalorder %s2026_s29, 1 }
   0xd   : > { %p330_p3 = scmp.ne.s32.totalorder %s1902_s26, %s1898_s25  ;;  %p331_p4 = scmp.eq.s32.totalorder %s1438_s30, 1 }
   0xe   : > { %s2041_s17 = scalar_select %p312_p1, %s1906_s27, %s314_s15  }
   0xf   : > { %p2043_p5 = por %p325_p2, %p324_p0  ;;  %p2047_p6 = por %p331_p4, %p330_p3 }
  0x10   : > { %2326 = sst [smem:[#allocation18_spill]] %s2041_s17  ;;  %p1439_p7 = scmp.ge.s32.totalorder %s1910_s28, 1 }
  0x11   : > { %s2327_s18 = scalar_select %p2043_p5, 1, 0 }
  0x12   : > { %s2328_s19 = scalar_select %p2047_p6, 1, 0 }
  0x13   : > { %p338_p8 = scmp.lt.s32.totalorder %s1910_s28, 3  ;;  %p2319_p9 = scmp.eq.s32.totalorder %s2026_s29, 0 }
  0x14   : > { %s1912_s21 = smov [#allocation6]   ;;  %s1913_s23 = smov [#allocation3]  }
  0x15   : > { %p2054_p10 = pnand %p1439_p7, %p338_p8  ;;  %s380_s22 = sshll.u32 %s1912_s21, 4  ;;  %s381_s22 = int_to_ptr.vmem [resolvable:$true] %s380_s22 }
  0x16   : > { %s369_s24 = sshll.u32 %s1913_s23, 4  ;;  %s1914_s15 = smov [#allocation8]   ;;  %s370_s24 = int_to_ptr.vmem [resolvable:$true] %s369_s24 }
  0x17   : > { %p1624_p11 = pneg %p2054_p10  ;;  %s390_s16 = sshll.u32 %s1914_s15, 4  ;;  %s2066_s16 = int_to_ptr.vmem [resolvable:$true] %s390_s16 }
  0x18   : > { %s1745_s21 = scalar_lea.vmem %s381_s22, 16  ;;  %s1752_s23 = scalar_lea.vmem %s381_s22, 32 }
  0x19   : > { %p2062_p12 = pnand %p2319_p9, %p1624_p11  ;;  %p1746_p0 = scmp.ne.s32.totalorder %s381_s22, %s1745_s21 }
  0x1a   : > { %p1753_p3 = scmp.lt.s32.totalorder %s381_s22, %s381_s22  ;;  %p1754_p4 = scmp.lt.s32.totalorder %s1752_s23, %s1745_s21 }
  0x1b   : > { %p1736_p13 = pneg %p2062_p12 }
  0x1c   : > { %p1755_p7 = por %p1754_p4, %p1753_p3 }
  0x1d   : > { %p1748_p1 = pnand %p1746_p0, %p1736_p13 }
  0x1f   : > { %p1749_p2 = pneg %p1748_p1 }
  0x21   : > { %p1756_p8 = pnand %p1755_p7, %p1749_p2 }
  0x23   : > { %1759 = shalt.err (!%p1756_p8)
}
  0x24   : > { %1630 = dma.hbm_to_vmem [thread:$0]  (!%p2062_p12), %s2312_s8, 16, %s381_s22, [#allocation7]  }
  0x25   : > { %s1771_s27 = scalar_lea.vmem %s370_s24, 16  ;;  %s1778_s14 = scalar_lea.vmem %s370_s24, 32 }
  0x26   : > { %p1772_p11 = scmp.ne.s32.totalorder %s370_s24, %s1771_s27  ;;  %p1779_p1 = scmp.lt.s32.totalorder %s370_s24, %s370_s24 }
  0x27   : > { %p1780_p6 = scmp.lt.s32.totalorder %s1778_s14, %s1771_s27 }
  0x28   : > { %p1774_p9 = pnand %p1772_p11, %p1736_p13 }
  0x29   : > { %p1781_p5 = por %p1780_p6, %p1779_p1 }
  0x2a   : > { %p1775_p0 = pneg %p1774_p9 }
  0x2c   : > { %p1782_p3 = pnand %p1781_p5, %p1775_p0 }
  0x2e   : > { %1785 = shalt.err (!%p1782_p3)
}
  0x2f   : > { %s2331_s7 = sld [smem:[#allocation19_spill]]  ;;  %s1797_s17 = scalar_lea.vmem %s2066_s16, 256 }
  0x30   : > { %p1798_p2 = scmp.ne.s32.totalorder %s2066_s16, %s1797_s17  ;;  %p1805_p6 = scmp.lt.s32.totalorder %s2066_s16, %s2066_s16 }
  0x31   : > { %p1806_p5 = scmp.lt.s32.totalorder %s1797_s17, %s1797_s17 }
  0x32   : > { %p1800_p9 = pnand %p1798_p2, %p1736_p13 }
  0x33   : > { %p1807_p7 = por %p1806_p5, %p1805_p6 }
  0x34   : > { %p1801_p4 = pneg %p1800_p9 }
  0x35   : > { %1627 = dma.hbm_to_vmem [thread:$0]  (!%p2062_p12), %s2331_s7, 16, %s370_s24, [#allocation4]  }
  0x36   : > { %p1808_p8 = pnand %p1807_p7, %p1801_p4 }
  0x38   : > { %1811 = shalt.err (!%p1808_p8)
}
  0x39   : > { %s1915_s27 = smov 64   ;;  %s1916_s14 = smov 4  }
  0x3a   : > { %1633 = dma.hbm_to_vmem [thread:$0]  (!%p2062_p12), %s2313_s9, 256, %s2066_s16, [#allocation7], %s1915_s27, %s1915_s27, %s1916_s14  }
  0x3b   : > { %s1917_s15 = smov [#allocation9]  }
  0x3c   : > { %s404_s21 = sshll.u32 %s1917_s15, 4  ;;  %s405_s21 = int_to_ptr.vmem [resolvable:$true] %s404_s21 }
  0x3d   : > { %s1823_s23 = scalar_lea.vmem %s405_s21, 16  ;;  %s1830_s17 = scalar_lea.vmem %s405_s21, 32 }
  0x3e   : > { %p1824_p11 = scmp.ne.s32.totalorder %s405_s21, %s1823_s23  ;;  %p1831_p3 = scmp.lt.s32.totalorder %s405_s21, %s405_s21 }
  0x3f   : > { %p1832_p2 = scmp.lt.s32.totalorder %s1830_s17, %s1823_s23 }
  0x40   : > { %p1826_p0 = pnand %p1824_p11, %p1736_p13 }
  0x41   : > { %p1833_p9 = por %p1832_p2, %p1831_p3 }
  0x42   : > { %p1827_p1 = pneg %p1826_p0 }
  0x44   : > { %p1834_p4 = pnand %p1833_p9, %p1827_p1 }
  0x46   : > { %1837 = shalt.err (!%p1834_p4)
}
  0x47   : > { %1636 = dma.hbm_to_vmem [thread:$0]  (!%p2062_p12), %s2314_s10, 16, %s405_s21, [#allocation10]  }
  0x48   : > { %430 = sbr.rel (%p2054_p10) target bundleno = 2525 (0x9dd), region = 72  ;;  %p2332_p6 = scmp.eq.s32.totalorder (!%p2054_p10), %s2026_s29, 0 }
  0x4d   : > { %1881 = dma.done.wait (%p2332_p6), [#allocation4], 16   ;;  %p2333_p13 = pmov %p2332_p6 }
  0x4e   : > { %p2334_p5 = pmov %p2332_p6 }
  0x4f   : > { %1883 = vsyncadd (%p2333_p13), [#allocation4], 4294967280 }
  0x50   : > { %1885 = dma.done.wait (%p2334_p5), [#allocation7], 272   ;;  %p2335_p7 = pmov %p2334_p5 }
  0x51   : > { %p2336_p8 = pmov %p2334_p5 }
  0x52   : > { %1887 = vsyncadd (%p2335_p7), [#allocation7], 4294967024 }
  0x53   : > { %1889 = dma.done.wait (%p2336_p8), [#allocation10], 16   ;;  %p2337_p12 = pmov %p2334_p5 }
  0x54   : > { %p485_p10 = scmp.lt.s32.totalorder %s2026_s29, 1  ;;  %vm493_vm0 = vcmask 261120   ;;  %v1704_v7 = vld [vmem:[%s2307_s3 + $0x8] sm:$0xff]   ;;  %v1918_v8 = vmov 0.0   ;;  %vm1919_vm1 = vmmov 0   ;;  %v1705_v9 = vld [vmem:[%s2307_s3] sm:$0xff]   ;;  %v589_v40 = vlaneseq }
  0x55   : > { %1891 = vsyncadd (%p2337_p12), [#allocation10], 4294967280  ;;  %1522 = vmatprep.subr.bf16.mxu0 %v1918_v8  ;;  %1526 = vmatprep.mubr.msk.bf16.mxu0 %vm1919_vm1, %v1918_v8  ;;  %v1452_v14 = vld [vmem:[%s2305_s1] ss:$0 sm:$0xff]  ;;  %s1920_s16 = smov 120   ;;  %s1922_s14 = smov 96  }
  0x56   : > { %s486_s7 = scalar_select %p485_p10, %s2026_s29, 1  ;;  %1523 = vmatpush3.bf16.msra.mxu0 %v1704_v7  ;;  %1530 = vmatprep.subr.bf16.mxu1 %v1918_v8  ;;  %v1453_v16 = vld [vmem:[%s2306_s2] ss:$0 sm:$0xff]  ;;  %vm600_vm2 = vcmask 64512   ;;  %v590_v41 = vshrl.u32 %v589_v40, 7  ;;  %v592_v42 = vand.u32 127, %v589_v40 }
  0x57   : > { %1524 = vmatprep.subr.bf16.mxu0 %v1918_v8  ;;  %1532 = vmatprep.mubr.msk.bf16.mxu1 %vm1919_vm1, %v1918_v8  ;;  %v1454_v20 = vld [vmem:[%s2308_s4] ss:$0 sm:$0xff]  ;;  %s1923_s24 = smov 72   ;;  %s1924_s15 = smov 80   ;;  %vm665_vm4 = vcmask 1043456   ;;  %vm710_vm5 = vcmask 60416  }
  0x58   : > { %s1451_s20 = sshll.u32 %s486_s7, 3  ;;  %s1925_s21 = smov 48   ;;  %vm593_vm3 = vcmp.le.s32.totalorder %v592_v42, %v590_v41  ;;  %vm831_vm6 = vcmask 126016   ;;  %vm951_vm7 = vcmask 191616   ;;  %vm1071_vm8 = vcmask 257216  }
  0x59   : > { %s488_s27 = scalar_lea.vmem %s2304_s0, %s1451_s20  ;;  %s1926_s23 = smov 56   ;;  %vm1278_vm9 = vcmask 523264  }
  0x5a   : > { %v2126_v0 = vld [vmem:[%s488_s27] sm:$0xff]  ;;  %1525 = vmatpush3.bf16.msra.mxu0 %v1705_v9  ;;  %s1921_s27 = smov 104   ;;  %s1927_s17 = smov 112  }
  0x5b   : > { %v494_v1 = vsel %vm493_vm0, %v2126_v0, 0.0  ;;  %1536 = vmatprep.subr.bf16.mxu0 %v1918_v8  ;;  %s1928_s22 = smov 88   ;;  %s1929_s7 = smov 64  }
  0x5c   : > { %495 = vadd.xlane.f32.xlu0 %v494_v1  ;;  %s1930_s20 = smov 40   ;;  %s1931_s30 = smov 8  }
  0x5d   : > { %p2338_p0 = scmp.ne.s32.totalorder %s2327_s18, 0 }
  0xe5   : > { %v496_v2 = vpop.xlane.xlu0 %495 }
  0xe6   : > { %v498_v3 = vmul.f32 0.03125, %v496_v2 }
  0xe8   : > { %v499_v4 = vsub.f32 %v2126_v0, %v498_v3 }
  0xea   : > { %v500_v5 = vmul.f32 %v499_v4, %v499_v4 }
  0xec   : > { %v501_v6 = vsel %vm493_vm0, %v500_v5, 0.0 }
  0xed   : > { %502 = vadd.xlane.f32.xlu0 %v501_v6 }
 0x176   : > { %v503_v10 = vpop.xlane.xlu0 %502 }
 0x177   : > { %v504_v11 = vmul.f32 0.03125, %v503_v10 }
 0x179   : > { %v505_v12 = vadd.f32 1e-05, %v504_v11 }
 0x17b   : > { %1714 = vrsqrt.f32 %v505_v12 }
 0x188   : > { %v1715_v13 = vpop.eup %1714 }
 0x189   : > { %v507_v15 = vmul.f32 %v1715_v13, %v499_v4 }
 0x18b   : > { %v514_v17 = vmul.f32 %v1452_v14, %v507_v15 }
 0x18d   : > { %v521_v18 = vadd.f32 %v1453_v16, %v514_v17 }
 0x18f   : > { %v522_v19 = vpack.c.bf16 %v521_v18, %v521_v18 }
 0x191   : > { %1527 = vmatmul.mubr.msk.bf16.vlgmr.msra.gmra.mxu0 %vm493_vm0, %v522_v19 }
 0x192   : > { %1538 = vmatprep.mubr.msk.bf16.mxu0 %vm1919_vm1, %v1918_v8 }
 0x251   : > { %v583_v21 = vpop.f32.mrf.mxu0 }
 0x252   : > { %v584_v22 = vadd.f32 %v1454_v20, %v583_v21 }
 0x253   : > { %v1528_v23 = vpop.f32.mrf.mxu0 }
 0x254   : > { %v594_v24 = vmul.f32 0.35355338, %v584_v22  ;;  %v2158_v25 = vpack.c.bf16 %v584_v22, %v584_v22 }
 0x255   : > { %v586_v26 = vpop.f32.mrf.mxu0 }
 0x256   : > { %v595_v27 = vpack.c.bf16 %v594_v24, %v594_v24  ;;  %598 = vrot.lane.b32.xlu1 %v2158_v25, %s1920_s16 }
 0x257   : > { %v1529_v28 = vpop.f32.mrf.mxu0 }
 0x258   : > { %713 = vrot.lane.b32.xlu0 %v595_v27, %s1921_s27 }
 0x25a   : > { %715 = vrot.lane.b32.xlu1 %v2158_v25, %s1922_s14 }
 0x25e   : > { %835 = vrot.lane.b32.xlu1 %v2158_v25, %s1923_s24  ;;  %s1934_s24 = smov [#allocation11]  }
 0x262   : > { %833 = vrot.lane.b32.xlu1 %v595_v27, %s1924_s15  ;;  %s1932_s15 = smov 16  }
 0x266   : > { %955 = vrot.lane.b32.xlu1 %v2158_v25, %s1925_s21  ;;  %s1933_s21 = smov 24  }
 0x26a   : > { %953 = vrot.lane.b32.xlu1 %v595_v27, %s1926_s23 }
 0x2c8   : > { %v599_v29 = vpop.permute.xlu1 %598 }
 0x2c9   : > { %v605_v30 = vsel %vm600_vm2, %v599_v29, 0 }
 0x2ca   : > { %1531 = vmatpush3.bf16.xpose.msra.mxu1 %v605_v30  ;;  %v714_v34 = vpop.permute.xlu0 %713 }
 0x2cb   : > { %1542 = vmatprep.subr.bf16.mxu1 %v1918_v8 }
 0x2cc   : > { %v716_v31 = vpop.permute.xlu1 %715 }
 0x2cd   : > { %v721_v32 = vsel %vm600_vm2, %v716_v31, 0 }
 0x2d0   : > { %v836_v33 = vpop.permute.xlu1 %835 }
 0x2d1   : > { %1533 = vmatmul.mubr.msk.bf16.vlgmr.msra.gmra.mxu1 %vm600_vm2, %v595_v27  ;;  %v841_v36 = vsel %vm600_vm2, %v836_v33, 0 }
 0x2d2   : > { %1543 = vmatpush3.bf16.xpose.msra.mxu1 %v721_v32  ;;  %1544 = vmatprep.mubr.msk.bf16.mxu1 %vm1919_vm1, %v1918_v8 }
 0x2d3   : > { %1554 = vmatprep.subr.bf16.mxu1 %v1918_v8 }
 0x2d4   : > { %v834_v35 = vpop.permute.xlu1 %833 }
 0x2d8   : > { %v956_v37 = vpop.permute.xlu1 %955 }
 0x2d9   : > { %1545 = vmatmul.mubr.msk.bf16.vlgmr.msra.gmra.mxu1 %vm600_vm2, %v714_v34  ;;  %v961_v38 = vsel %vm600_vm2, %v956_v37, 0 }
 0x2da   : > { %1555 = vmatpush3.bf16.xpose.msra.mxu1 %v841_v36  ;;  %1556 = vmatprep.mubr.msk.bf16.mxu1 %vm1919_vm1, %v1918_v8 }
 0x2db   : > { %1566 = vmatprep.subr.bf16.mxu1 %v1918_v8 }
 0x2dc   : > { %v954_v39 = vpop.permute.xlu1 %953 }
 0x2e1   : > { %1557 = vmatmul.mubr.msk.bf16.vlgmr.msra.gmra.mxu1 %vm600_vm2, %v834_v35 }
 0x2e2   : > { %1567 = vmatpush3.bf16.xpose.msra.mxu1 %v961_v38  ;;  %1568 = vmatprep.mubr.msk.bf16.mxu1 %vm1919_vm1, %v1918_v8 }
 0x2e3   : > { %1578 = vmatprep.subr.bf16.mxu1 %v1918_v8 }
 0x2e9   : > { %1569 = vmatmul.mubr.msk.bf16.vlgmr.msra.gmra.mxu1 %vm600_vm2, %v954_v39 }
 0x2ea   : > { %1582 = vmatprep.mubr.msk.bf16.mxu1 %vm1919_vm1, %v1918_v8 }
 0x391   : > { %v641_v43 = vpop.f32.mrf.mxu1 }
 0x392   : > { %v647_v44 = vsel %vm593_vm3, %v641_v43, -1e+09 }
 0x393   : > { %v1534_v45 = vpop.f32.mrf.mxu1  ;;  %v648_v46 = vsel %vm600_vm2, %v647_v44, -inf }
 0x394   : > { %649 = vmax.xlane.f32.xlu1 %v648_v46 }
 0x395   : > { %v644_v47 = vpop.f32.mrf.mxu1 }
 0x397   : > { %v1535_v48 = vpop.f32.mrf.mxu1 }
 0x399   : > { %v757_v49 = vpop.f32.mrf.mxu1 }
 0x39a   : > { %v763_v50 = vsel %vm593_vm3, %v757_v49, -1e+09 }
 0x39b   : > { %v1546_v51 = vpop.f32.mrf.mxu1  ;;  %v764_v52 = vsel %vm600_vm2, %v763_v50, -inf }
 0x39c   : > { %765 = vmax.xlane.f32.xlu0 %v764_v52 }
 0x39d   : > { %v760_v53 = vpop.f32.mrf.mxu1 }
 0x39f   : > { %v1547_v54 = vpop.f32.mrf.mxu1 }
 0x3a1   : > { %v877_v55 = vpop.f32.mrf.mxu1 }
 0x3a2   : > { %v883_v56 = vsel %vm593_vm3, %v877_v55, -1e+09 }
 0x3a3   : > { %v1558_v57 = vpop.f32.mrf.mxu1  ;;  %v884_v58 = vsel %vm600_vm2, %v883_v56, -inf }
 0x3a4   : > { %885 = vmax.xlane.f32.xlu1 %v884_v58 }
 0x3a5   : > { %v880_v59 = vpop.f32.mrf.mxu1 }
 0x3a6   : > { %v1706_v59 = vld [vmem:[%s2309_s5 + $0x8] sm:$0xff]  }
 0x3a7   : > { %v1559_v60 = vpop.f32.mrf.mxu1  ;;  %1579 = vmatpush3.bf16.msra.mxu1 %v1706_v59 }
 0x3a8   : > { %1580 = vmatprep.subr.bf16.mxu1 %v1918_v8 }
 0x3a9   : > { %v997_v61 = vpop.f32.mrf.mxu1 }
 0x3aa   : > { %v1003_v62 = vsel %vm593_vm3, %v997_v61, -1e+09  ;;  %v1707_v61 = vld [vmem:[%s2309_s5] sm:$0xff]  }
 0x3ab   : > { %v1570_v63 = vpop.f32.mrf.mxu1  ;;  %v1004_v1 = vsel %vm600_vm2, %v1003_v62, -inf  ;;  %1581 = vmatpush3.bf16.msra.mxu1 %v1707_v61 }
 0x3ac   : > { %1005 = vmax.xlane.f32.xlu0 %v1004_v1  ;;  %1594 = vmatprep.subr.bf16.mxu1 %v1918_v8 }
 0x3ad   : > { %v1000_v2 = vpop.f32.mrf.mxu1 }
 0x3af   : > { %v1571_v3 = vpop.f32.mrf.mxu1 }
 0x41d   : > { %v650_v4 = vpop.xlane.xlu1 %649 }
 0x41e   : > { %v651_v5 = vsub.f32 %v647_v44, %v650_v4 }
 0x420   : > { %v652_v6 = vmul.f32 1.442695, %v651_v5 }
 0x422   : > { %1716 = vpow2.f32 %v652_v6 }
 0x425   : > { %v766_v7 = vpop.xlane.xlu0 %765 }
 0x426   : > { %v767_v9 = vsub.f32 %v763_v50, %v766_v7 }
 0x428   : > { %v768_v10 = vmul.f32 1.442695, %v767_v9 }
 0x42a   : > { %1718 = vpow2.f32 %v768_v10 }
 0x42d   : > { %v886_v20 = vpop.xlane.xlu1 %885 }
 0x42e   : > { %v887_v21 = vsub.f32 %v883_v56, %v886_v20 }
 0x42f   : > { %v1717_v11 = vpop.eup %1716 }
 0x430   : > { %v654_v12 = vsel %vm600_vm2, %v1717_v11, 0.0  ;;  %v888_v22 = vmul.f32 1.442695, %v887_v21 }
 0x431   : > { %655 = vadd.xlane.f32.xlu1 %v654_v12 }
 0x435   : > { %v1006_v13 = vpop.xlane.xlu0 %1005 }
 0x436   : > { %v1007_v14 = vsub.f32 %v1003_v62, %v1006_v13  ;;  %v1469_v13 = vld [vmem:[%s2310_s6] ss:$0 sm:$0xff] }
 0x437   : > { %v1719_v15 = vpop.eup %1718 }
 0x438   : > { %v1008_v16 = vmul.f32 1.442695, %v1007_v14  ;;  %v770_v17 = vsel %vm600_vm2, %v1719_v15, 0.0 }
 0x439   : > { %771 = vadd.xlane.f32.xlu0 %v770_v17 }
 0x43a   : > { %1720 = vpow2.f32 %v1008_v16 }
 0x43b   : > { %1722 = vpow2.f32 %v888_v22 }
 0x442   : > { %660 = vrot.lane.b32.xlu1 %v2158_v25, %s1927_s17 }
 0x447   : > { %v1721_v18 = vpop.eup %1720 }
 0x448   : > { %v1010_v19 = vsel %vm600_vm2, %v1721_v18, 0.0  ;;  %v1723_v23 = vpop.eup %1722 }
 0x449   : > { %1011 = vadd.xlane.f32.xlu0 %v1010_v19  ;;  %v890_v24 = vsel %vm600_vm2, %v1723_v23, 0.0 }
 0x45f   : > { %776 = vrot.lane.b32.xlu0 %v2158_v25, %s1928_s22  ;;  %s1486_s22 = sshll.u32 %s2026_s29, 7 }
 0x460   : > { %s2262_s27 = scalar_lea.hbm %s2317_s13, %s1486_s22 }
 0x466   : > { %891 = vadd.xlane.f32.xlu1 %v890_v24 }
 0x477   : > { %896 = vrot.lane.b32.xlu1 %v2158_v25, %s1929_s7 }
 0x47b   : > { %1016 = vrot.lane.b32.xlu1 %v2158_v25, %s1930_s20 }
 0x4ba   : > { %v656_v26 = vpop.xlane.xlu1 %655 }
 0x4bb   : > { %1724 = vrcp.f32 %v656_v26 }
 0x4be   : > { %v661_v27 = vpop.permute.xlu1 %660 }
 0x4bf   : > { %v667_v28 = vsel %vm665_vm4, %v661_v27, 0  ;;  %v1708_v27 = vld [vmem:[#allocation8 + $0x8] sm:$0xff]  }
 0x4c0   : > { %1537 = vmatpush3.bf16.msra.mxu0 %v667_v28  ;;  %v1709_v28 = vld [vmem:[#allocation8] sm:$0xff]  }
 0x4c1   : > { %1548 = vmatprep.subr.bf16.mxu0 %v1918_v8 }
 0x4c2   : > { %v772_v29 = vpop.xlane.xlu0 %771 }
 0x4c3   : > { %1726 = vrcp.f32 %v772_v29  ;;  %v1711_v29 = vld [vmem:[%s2315_s11 + $0x10] sm:$0xff]  }
 0x4c8   : > { %v1725_v30 = vpop.eup %1724 }
 0x4c9   : > { %v658_v31 = vmul.f32 %v1725_v30, %v1717_v11 }
 0x4cb   : > { %v659_v32 = vpack.c.bf16 %v658_v31, %v658_v31 }
 0x4cd   : > { %1539 = vmatmul.mubr.msk.bf16.vlgmr.msra.gmra.mxu0 %vm600_vm2, %v659_v32 }
 0x4ce   : > { %1550 = vmatprep.mubr.msk.bf16.mxu0 %vm1919_vm1, %v1918_v8 }
 0x4d0   : > { %v1727_v25 = vpop.eup %1726 }
 0x4d1   : > { %v774_v34 = vmul.f32 %v1727_v25, %v1719_v15 }
 0x4d2   : > { %v1012_v33 = vpop.xlane.xlu0 %1011 }
 0x4d3   : > { %v775_v37 = vpack.c.bf16 %v774_v34, %v774_v34 }
 0x4d6   : > { %v777_v35 = vpop.permute.xlu0 %776 }
 0x4d7   : > { %v782_v36 = vsel %vm665_vm4, %v777_v35, 0  ;;  %v1474_v35 = vld [vmem:[#allocation6] ss:$0 sm:$0xff] }
 0x4d8   : > { %1549 = vmatpush3.bf16.msra.mxu0 %v782_v36 }
 0x4d9   : > { %1560 = vmatprep.subr.bf16.mxu0 %v1918_v8 }
 0x4db   : > { %1551 = vmatmul.mubr.msk.bf16.vlgmr.msra.gmra.mxu0 %vm600_vm2, %v775_v37 }
 0x4dc   : > { %1562 = vmatprep.mubr.msk.bf16.mxu0 %vm1919_vm1, %v1918_v8 }
 0x4ef   : > { %v892_v38 = vpop.xlane.xlu1 %891 }
 0x4f0   : > { %1728 = vrcp.f32 %v892_v38 }
 0x4f1   : > { %1730 = vrcp.f32 %v1012_v33  ;;  %v1473_v33 = vld [vmem:[#allocation3] ss:$0 sm:$0xff] }
 0x4f3   : > { %v897_v39 = vpop.permute.xlu1 %896 }
 0x4f4   : > { %v902_v40 = vsel %vm665_vm4, %v897_v39, 0  ;;  %v1712_v39 = vld [vmem:[%s2315_s11 + $0x8] sm:$0xff]  }
 0x4f5   : > { %1561 = vmatpush3.bf16.msra.mxu0 %v902_v40  ;;  %v1713_v40 = vld [vmem:[%s2315_s11] sm:$0xff]  }
 0x4f6   : > { %1572 = vmatprep.subr.bf16.mxu0 %v1918_v8 }
 0x4f7   : > { %v1017_v43 = vpop.permute.xlu1 %1016 }
 0x4f8   : > { %v1022_v46 = vsel %vm665_vm4, %v1017_v43, 0 }
 0x4fd   : > { %v1729_v41 = vpop.eup %1728 }
 0x4fe   : > { %v894_v42 = vmul.f32 %v1729_v41, %v1723_v23  ;;  %v1731_v45 = vpop.eup %1730  ;;  %v1475_v41 = vld [vmem:[#allocation9] ss:$0 sm:$0xff] }
 0x4ff   : > { %v1014_v47 = vmul.f32 %v1731_v45, %v1721_v18 }
 0x500   : > { %v895_v44 = vpack.c.bf16 %v894_v42, %v894_v42 }
 0x501   : > { %v1015_v48 = vpack.c.bf16 %v1014_v47, %v1014_v47 }
 0x502   : > { %1563 = vmatmul.mubr.msk.bf16.vlgmr.msra.gmra.mxu0 %vm600_vm2, %v895_v44 }
 0x503   : > { %1573 = vmatpush3.bf16.msra.mxu0 %v1022_v46  ;;  %1574 = vmatprep.mubr.msk.bf16.mxu0 %vm1919_vm1, %v1918_v8 }
 0x504   : > { %1586 = vmatprep.subr.bf16.mxu0 %v1918_v8 }
 0x50a   : > { %1575 = vmatmul.mubr.msk.bf16.vlgmr.msra.gmra.mxu0 %vm600_vm2, %v1015_v48 }
 0x50b   : > { %1590 = vmatprep.mubr.msk.bf16.mxu0 %vm1919_vm1, %v1918_v8  ;;  %1587 = vmatpush3.bf16.msra.mxu0 %v1708_v27 }
 0x50c   : > { %1588 = vmatprep.subr.bf16.mxu0 %v1918_v8 }
 0x50f   : > { %1589 = vmatpush3.bf16.msra.mxu0 %v1709_v28 }
 0x58d   : > { %v703_v49 = vpop.f32.mrf.mxu0 }
 0x58e   : > { %v709_v50 = vpack.c.bf16 %v703_v49, %v703_v49 }
 0x58f   : > { %v1540_v51 = vpop.f32.mrf.mxu0 }
 0x590   : > { %711 = vst.msk [vmem:[#allocation2] sm:$0xf] %vm710_vm5, %v709_v50 }
 0x591   : > { %v706_v52 = vpop.f32.mrf.mxu0 }
 0x593   : > { %v1541_v53 = vpop.f32.mrf.mxu0 }
 0x59b   : > { %v818_v54 = vpop.f32.mrf.mxu0 }
 0x59c   : > { %v1489_v55 = vpack.c.bf16 %v818_v54, %v818_v54 }
 0x59d   : > { %v1552_v56 = vpop.f32.mrf.mxu0 }
 0x59e   : > { %828 = vrot.lane.b32.xlu0 %v1489_v55, %s1931_s30 }
 0x59f   : > { %v821_v57 = vpop.f32.mrf.mxu0 }
 0x5a1   : > { %v1553_v58 = vpop.f32.mrf.mxu0 }
 0x5c2   : > { %v938_v60 = vpop.f32.mrf.mxu0 }
 0x5c3   : > { %v1490_v62 = vpack.c.bf16 %v938_v60, %v938_v60 }
 0x5c4   : > { %v1564_v63 = vpop.f32.mrf.mxu0 }
 0x5c5   : > { %948 = vrot.lane.b32.xlu1 %v1490_v62, %s1932_s15  ;;  %s482_s15 = sand.u32 1, %s1902_s26  }
 0x5c6   : > { %v941_v1 = vpop.f32.mrf.mxu0  ;;  %s1325_s29 = scalar_lea.sflag [#allocation5], %s482_s15 }
 0x5c8   : > { %v1565_v2 = vpop.f32.mrf.mxu0 }
 0x5ca   : > { %v1058_v3 = vpop.f32.mrf.mxu0 }
 0x5cb   : > { %v1491_v4 = vpack.c.bf16 %v1058_v3, %v1058_v3 }
 0x5cc   : > { %v1576_v5 = vpop.f32.mrf.mxu0 }
 0x5cd   : > { %1068 = vrot.lane.b32.xlu0 %v1491_v4, %s1933_s21  ;;  %s1450_s21 = sshll.u32 %s482_s15, 3 }
 0x5ce   : > { %v1061_v6 = vpop.f32.mrf.mxu0  ;;  %s484_s7 = scalar_lea.vmem [#allocation11], %s1450_s21  ;;  %s1842_s21 = sshll.u32 %s1934_s24, 4  ;;  %s1843_s21 = int_to_ptr.vmem [resolvable:$false] %s1842_s21 }
 0x5cf   : > { %s1338_s20 = sshll.u32 %s484_s7, 4  ;;  %s1844_s23 = scalar_lea.vmem %s1843_s21, 256  ;;  %s2264_s20 = int_to_ptr.vmem [resolvable:$true] %s1338_s20 }
 0x5d0   : > { %v1577_v7 = vpop.f32.mrf.mxu0  ;;  %s1838_s14 = scalar_lea.vmem %s2264_s20, 128  ;;  %p1845_p2 = scmp.lt.s32.totalorder %s2264_s20, %s1843_s21 }
 0x5d1   : > { %p1839_p11 = scmp.ne.s32.totalorder %s2264_s20, %s1838_s14  ;;  %p1846_p9 = scmp.lt.s32.totalorder %s1844_s23, %s1838_s14 }
 0x5d3   : > { %p1840_p1 = pnand %p1839_p11, %p2338_p0  ;;  %p1847_p4 = por %p1846_p9, %p1845_p2 }
 0x5d5   : > { %p1841_p3 = pneg %p1840_p1 }
 0x5d7   : > { %p1848_p6 = pnand %p1847_p4, %p1841_p3 }
 0x610   : > { %v829_v9 = vpop.permute.xlu0 %828 }
 0x611   : > { %832 = vst.msk [vmem:[#allocation2] sm:$0xf] %vm831_vm6, %v829_v9 }
 0x637   : > { %v949_v10 = vpop.permute.xlu1 %948 }
 0x638   : > { %952 = vst.msk [vmem:[#allocation2] sm:$0xf] %vm951_vm7, %v949_v10 }
 0x63f   : > { %v1069_v11 = vpop.permute.xlu0 %1068 }
 0x640   : > { %1072 = vst.msk [vmem:[#allocation2] sm:$0xf] %vm1071_vm8, %v1069_v11 }
 0x647   : > { %v1073_v12 = vld [vmem:[#allocation2] sm:$0xf] }
 0x648   : > { %1583 = vmatmul.mubr.msk.bf16.vlgmr.msra.gmra.mxu1 %vm493_vm0, %v1073_v12 }
 0x649   : > { %1602 = vmatprep.mubr.msk.bf16.mxu1 %vm1919_vm1, %v1918_v8 }
 0x708   : > { %v1134_v14 = vpop.f32.mrf.mxu1 }
 0x709   : > { %v1135_v15 = vadd.f32 %v1469_v13, %v1134_v14 }
 0x70a   : > { %v1584_v16 = vpop.f32.mrf.mxu1 }
 0x70b   : > { %v1140_v17 = vadd.f32 %v1135_v15, %v2126_v0  ;;  %v1710_v0 = vld [vmem:[%s2315_s11 + $0x18] sm:$0xff]  }
 0x70c   : > { %v1137_v18 = vpop.f32.mrf.mxu1  ;;  %1595 = vmatpush3.bf16.msra.mxu1 %v1710_v0 }
 0x70d   : > { %v1143_v19 = vsel %vm493_vm0, %v1140_v17, 0.0  ;;  %1596 = vmatprep.subr.bf16.mxu1 %v1918_v8 }
 0x70e   : > { %1144 = vadd.xlane.f32.xlu1 %v1143_v19  ;;  %v1585_v20 = vpop.f32.mrf.mxu1 }
 0x710   : > { %1597 = vmatpush3.bf16.msra.mxu1 %v1711_v29 }
 0x711   : > { %1598 = vmatprep.subr.bf16.mxu1 %v1918_v8 }
 0x714   : > { %1599 = vmatpush3.bf16.msra.mxu1 %v1712_v39 }
 0x715   : > { %1600 = vmatprep.subr.bf16.mxu1 %v1918_v8  ;;  %v1479_v8 = vld [vmem:[%s2316_s12] ss:$0 sm:$0xff] }
 0x718   : > { %1601 = vmatpush3.bf16.msra.mxu1 %v1713_v40 }
 0x797   : > { %v1145_v21 = vpop.xlane.xlu1 %1144 }
 0x798   : > { %v1146_v22 = vmul.f32 0.03125, %v1145_v21 }
 0x79a   : > { %v1147_v23 = vsub.f32 %v1140_v17, %v1146_v22 }
 0x79c   : > { %v1148_v24 = vmul.f32 %v1147_v23, %v1147_v23 }
 0x79e   : > { %v1149_v26 = vsel %vm493_vm0, %v1148_v24, 0.0 }
 0x79f   : > { %1150 = vadd.xlane.f32.xlu0 %v1149_v26 }
 0x828   : > { %v1151_v30 = vpop.xlane.xlu0 %1150 }
 0x829   : > { %v1152_v31 = vmul.f32 0.03125, %v1151_v30 }
 0x82b   : > { %v1153_v32 = vadd.f32 1e-05, %v1152_v31 }
 0x82d   : > { %1732 = vrsqrt.f32 %v1153_v32 }
 0x83a   : > { %v1733_v25 = vpop.eup %1732 }
 0x83b   : > { %v1155_v34 = vmul.f32 %v1733_v25, %v1147_v23 }
 0x83d   : > { %v1162_v36 = vmul.f32 %v1473_v33, %v1155_v34 }
 0x83f   : > { %v1169_v37 = vadd.f32 %v1474_v35, %v1162_v36 }
 0x841   : > { %v1170_v38 = vpack.c.bf16 %v1169_v37, %v1169_v37 }
 0x843   : > { %1591 = vmatmul.mubr.msk.bf16.vlgmr.msra.gmra.mxu0 %vm493_vm0, %v1170_v38 }
 0x903   : > { %v1231_v42 = vpop.f32.mrf.mxu0 }
 0x904   : > { %v1232_v43 = vadd.f32 %v1475_v41, %v1231_v42 }
 0x905   : > { %v1592_v44 = vpop.f32.mrf.mxu0 }
 0x906   : > { %v1237_v45 = vmax.f32 %v1232_v43, 0.0 }
 0x907   : > { %v1234_v46 = vpop.f32.mrf.mxu0 }
 0x908   : > { %v1238_v47 = vpack.c.bf16 %v1237_v45, %v1237_v45 }
 0x909   : > { %v1593_v48 = vpop.f32.mrf.mxu0 }
 0x90a   : > { %1603 = vmatmul.mubr.msk.bf16.vlgmr.msra.gmra.mxu1 %vm1278_vm9, %v1238_v47 }
 0x9ca   : > { %v1316_v49 = vpop.f32.mrf.mxu1 }
 0x9cb   : > { %v1317_v50 = vadd.f32 %v1479_v8, %v1316_v49 }
 0x9cc   : > { %v1604_v51 = vpop.f32.mrf.mxu1 }
 0x9cd   : > { %v1322_v52 = vadd.f32 %v1317_v50, %v1140_v17 }
 0x9ce   : > { %v1319_v53 = vpop.f32.mrf.mxu1 }
 0x9cf   : > { %1323 = vst.msk [vmem:[%s484_s7] sm:$0xff] %vm493_vm0, %v1322_v52 }
 0x9d0   : > { %v1605_v54 = vpop.f32.mrf.mxu1 }
 0x9d1   : > { %1851 = shalt.err (!%p1848_p6)
}
 0x9d2   : > { %s1852_s17 = scalar_lea.hbm %s2262_s27, 128  ;;  %s1856_s7 = scalar_lea.hbm %s2317_s13, 256 }
 0x9d3   : > { %p1853_p13 = scmp.ne.s32.totalorder %s2262_s27, %s1852_s17  ;;  %p1857_p8 = scmp.lt.s32.totalorder %s2262_s27, %s2317_s13 }
 0x9d4   : > { %p1858_p12 = scmp.lt.s32.totalorder %s1856_s7, %s1852_s17 }
 0x9d5   : > { %p1854_p5 = pnand %p1853_p13, %p2338_p0 }
 0x9d6   : > { %p1859_p10 = por %p1858_p12, %p1857_p8 }
 0x9d7   : > { %p1855_p7 = pneg %p1854_p5 }
 0x9d9   : > { %p1860_p11 = pnand %p1859_p10, %p1855_p7 }
 0x9db   : > { %1863 = shalt.err (!%p1860_p11)
}
 0x9dc   : > { %1622 = dma.vmem_to_hbm [thread:$0]  (%p2338_p0), %s2264_s20, 128, %s2262_s27, %s1325_s29  }
 0x9dd PF: > { %p1649_p1 = scmp.ge.s32.totalorder %s1910_s28, 2  ;;  %s1350_s14 = sand.u32 1, %s1898_s25  }
 0x9de   : > { %p2339_p3 = scmp.ne.s32.totalorder %s2328_s19, 0  ;;  %s1351_s24 = scalar_lea.sflag [#allocation5], %s1350_s14 }
 0x9e0   : > { %p1638_p2 = pnand %p1649_p1, %p2339_p3 }
 0x9e2   : > { %p1639_p9 = pneg %p1638_p2 }
 0x9e4   : > { %1893 = dma.done.wait (%p1639_p9), %s1351_s24, 128  }
 0x9e5   : > { %1895 = vsyncadd (%p1639_p9), %s1351_s24, 4294967168  ;;  %s2340_s28 = sld [smem:[#allocation17_spill]]  ;;  %s2343_s25 = smov %s1902_s26 }
 0x9e6   : > { %s2341_s21 = sld [smem:[#allocation16_spill]] }
 0x9e7   : > { %s2342_s27 = sld [smem:[#allocation18_spill]] }
 0x9eb   : > { %p26_p4 = scmp.ge.s32.totalorder %s2340_s28, 4  }
 0x9ec   : > { %s2344_s26 = smov %s2341_s21 }
 0x9ed   :  { %28 = sbr.rel (!%p26_p4) target bundleno = 8 (0x8), region = 124 }
 0x9f2   :  { %1356 = vsyncpa [#allocation4], 1 }
 0x9f3   :  { %1358 = vsyncpa [#allocation4 + $0x1], 1 }
 0x9f4   :  { %1359 = vsyncpa [#allocation7], 1 }
 0x9f5   :  { %1360 = vsyncpa [#allocation10], 1 }
 0x9f6   :  { %1361 = vsyncpa [#allocation5], 1 }
 0x9f7   :  { %1363 = vsyncpa [#allocation5 + $0x1], 1 }

// kernel: tpu_custom_call.1
= control target key start
LH: loop header
LB: loop body
LE: loop exit
PB: predicated region body
PF: predicated region fallthrough
CT: control target
= control target key end

     0   :  { %s2304_s0 = inlined_call_operand.vmem [shape: f32[2,8,32], index: 0, kind: input, shape index: {}]   ;;  %s2305_s1 = inlined_call_operand.vmem [shape: f32[1,32], index: 1, kind: input, shape index: {}]   ;;  %s2306_s2 = inlined_call_operand.vmem [shape: f32[1,32], index: 2, kind: input, shape index: {}]   ;;  %s2307_s3 = inlined_call_operand.vmem [shape: bf16[32,96], index: 3, kind: input, shape index: {}]   ;;  %s2308_s4 = inlined_call_operand.vmem [shape: f32[1,96], index: 4, kind: input, shape index: {}]   ;;  %s2309_s5 = inlined_call_operand.vmem [shape: bf16[32,32], index: 5, kind: input, shape index: {}]   ;;  %s2310_s6 = inlined_call_operand.vmem [shape: f32[1,32], index: 6, kind: input, shape index: {}]   ;;  %s2311_s7 = inlined_call_operand.hbm [shape: f32[1,32], index: 7, kind: input, shape index: {}]   ;;  %s2312_s8 = inlined_call_operand.hbm [shape: f32[1,32], index: 8, kind: input, shape index: {}]   ;;  %s2313_s9 = inlined_call_operand.hbm [shape: bf16[32,64], index: 9, kind: input, shape index: {}]   ;;  %s2314_s10 = inlined_call_operand.hbm [shape: f32[1,64], index: 10, kind: input, shape index: {}]   ;;  %s2315_s11 = inlined_call_operand.vmem [shape: bf16[64,32], index: 11, kind: input, shape index: {}]   ;;  %s2316_s12 = inlined_call_operand.vmem [shape: f32[1,32], index: 12, kind: input, shape index: {}]   ;;  %s2317_s13 = inlined_call_operand.hbm [shape: f32[2,8,32], index: 13, kind: output, shape index: {}]  }
   0x1   :  { %2323 = sst [smem:[#allocation19_spill]] %s2311_s7 }
   0x2   :  { %18 = vsyncpa [#allocation4], 0 }
   0x3   :  { %19 = vsyncpa [#allocation7], 0 }
   0x4   :  { %20 = vsyncpa [#allocation10], 0 }
   0x5   :  { %21 = vsyncpa [#allocation5], 0 }
   0x6   :  { %23 = vsyncpa [#allocation5 + $0x1], 0  ;;  %s2005_s25 = smov 0   ;;  %s2007_s26 = smov 0  }
   0x7   :  { %s2009_s27 = smov 0   ;;  %s2011_s28 = smov 0  }
   0x8 LB: > { %2324 = sst [smem:[#allocation16_spill]] %s1906_s27  ;;  %s2026_s29 = sadd.s32 4294967295, %s1910_s28   ;;  %s1910_s28 = sphi %s2011_s28, %s2340_s28   ;;  %s1906_s27 = sphi %s2009_s27, %s2342_s27   ;;  %s1902_s26 = sphi %s2007_s26, %s2344_s26   ;;  %s1898_s25 = sphi %s2005_s25, %s2343_s25  }
   0x9   : > { %s1438_s30 = sadd.s32 4294967294, %s1910_s28   ;;  %s2030_s14 = sadd.s32 1, %s1910_s28  }
   0xa   : > { %2325 = sst [smem:[#allocation17_spill]] %s2030_s14  ;;  %s314_s15 = sadd.s32 1, %s1906_s27 }
   0xb   : > { %s311_s16 = ssub.s32 %s1910_s28, %s2030_s14  ;;  %p324_p0 = scmp.ne.s32.totalorder %s1906_s27, %s1902_s26 }
   0xc   : > { %p312_p1 = scmp.eq.s32.totalorder %s311_s16, 0  ;;  %p325_p2 = scmp.eq.s32.totalorder %s2026_s29, 1 }
   0xd   : > { %p330_p3 = scmp.ne.s32.totalorder %s1902_s26, %s1898_s25  ;;  %p331_p4 = scmp.eq.s32.totalorder %s1438_s30, 1 }
   0xe   : > { %s2041_s17 = scalar_select %p312_p1, %s1906_s27, %s314_s15  }
   0xf   : > { %p2043_p5 = por %p325_p2, %p324_p0  ;;  %p2047_p6 = por %p331_p4, %p330_p3 }
  0x10   : > { %2326 = sst [smem:[#allocation18_spill]] %s2041_s17  ;;  %p1439_p7 = scmp.ge.s32.totalorder %s1910_s28, 1 }
  0x11   : > { %s2327_s18 = scalar_select %p2043_p5, 1, 0 }
  0x12   : > { %s2328_s19 = scalar_select %p2047_p6, 1, 0 }
  0x13   : > { %p338_p8 = scmp.lt.s32.totalorder %s1910_s28, 3  ;;  %p2319_p9 = scmp.eq.s32.totalorder %s2026_s29, 0 }
  0x14   : > { %s1912_s21 = smov [#allocation6]   ;;  %s1913_s23 = smov [#allocation3]  }
  0x15   : > { %p2054_p10 = pnand %p1439_p7, %p338_p8  ;;  %s380_s22 = sshll.u32 %s1912_s21, 4  ;;  %s381_s22 = int_to_ptr.vmem [resolvable:$true] %s380_s22 }
  0x16   : > { %s369_s24 = sshll.u32 %s1913_s23, 4  ;;  %s1914_s15 = smov [#allocation8]   ;;  %s370_s24 = int_to_ptr.vmem [resolvable:$true] %s369_s24 }
  0x17   : > { %p1624_p11 = pneg %p2054_p10  ;;  %s390_s16 = sshll.u32 %s1914_s15, 4  ;;  %s2066_s16 = int_to_ptr.vmem [resolvable:$true] %s390_s16 }
  0x18   : > { %s1745_s21 = scalar_lea.vmem %s381_s22, 16  ;;  %s1752_s23 = scalar_lea.vmem %s381_s22, 32 }
  0x19   : > { %p2062_p12 = pnand %p2319_p9, %p1624_p11  ;;  %p1746_p0 = scmp.ne.s32.totalorder %s381_s22, %s1745_s21 }
  0x1a   : > { %p1753_p3 = scmp.lt.s32.totalorder %s381_s22, %s381_s22  ;;  %p1754_p4 = scmp.lt.s32.totalorder %s1752_s23, %s1745_s21 }
  0x1b   : > { %p1736_p13 = pneg %p2062_p12 }
  0x1c   : > { %p1755_p7 = por %p1754_p4, %p1753_p3 }
  0x1d   : > { %p1748_p1 = pnand %p1746_p0, %p1736_p13 }
  0x1f   : > { %p1749_p2 = pneg %p1748_p1 }
  0x21   : > { %p1756_p8 = pnand %p1755_p7, %p1749_p2 }
  0x23   : > { %1759 = shalt.err (!%p1756_p8)
}
  0x24   : > { %1630 = dma.hbm_to_vmem [thread:$0]  (!%p2062_p12), %s2312_s8, 16, %s381_s22, [#allocation7]  }
  0x25   : > { %s1771_s27 = scalar_lea.vmem %s370_s24, 16  ;;  %s1778_s14 = scalar_lea.vmem %s370_s24, 32 }
  0x26   : > { %p1772_p11 = scmp.ne.s32.totalorder %s370_s24, %s1771_s27  ;;  %p1779_p1 = scmp.lt.s32.totalorder %s370_s24, %s370_s24 }
  0x27   : > { %p1780_p6 = scmp.lt.s32.totalorder %s1778_s14, %s1771_s27 }
  0x28   : > { %p1774_p9 = pnand %p1772_p11, %p1736_p13 }
  0x29   : > { %p1781_p5 = por %p1780_p6, %p1779_p1 }
  0x2a   : > { %p1775_p0 = pneg %p1774_p9 }
  0x2c   : > { %p1782_p3 = pnand %p1781_p5, %p1775_p0 }
  0x2e   : > { %1785 = shalt.err (!%p1782_p3)
}
  0x2f   : > { %s2331_s7 = sld [smem:[#allocation19_spill]]  ;;  %s1797_s17 = scalar_lea.vmem %s2066_s16, 256 }
  0x30   : > { %p1798_p2 = scmp.ne.s32.totalorder %s2066_s16, %s1797_s17  ;;  %p1805_p6 = scmp.lt.s32.totalorder %s2066_s16, %s2066_s16 }
  0x31   : > { %p1806_p5 = scmp.lt.s32.totalorder %s1797_s17, %s1797_s17 }
  0x32   : > { %p1800_p9 = pnand %p1798_p2, %p1736_p13 }
  0x33   : > { %p1807_p7 = por %p1806_p5, %p1805_p6 }
  0x34   : > { %p1801_p4 = pneg %p1800_p9 }
  0x35   : > { %1627 = dma.hbm_to_vmem [thread:$0]  (!%p2062_p12), %s2331_s7, 16, %s370_s24, [#allocation4]  }
  0x36   : > { %p1808_p8 = pnand %p1807_p7, %p1801_p4 }
  0x38   : > { %1811 = shalt.err (!%p1808_p8)
}
  0x39   : > { %s1915_s27 = smov 64   ;;  %s1916_s14 = smov 4  }
  0x3a   : > { %1633 = dma.hbm_to_vmem [thread:$0]  (!%p2062_p12), %s2313_s9, 256, %s2066_s16, [#allocation7], %s1915_s27, %s1915_s27, %s1916_s14  }
  0x3b   : > { %s1917_s15 = smov [#allocation9]  }
  0x3c   : > { %s404_s21 = sshll.u32 %s1917_s15, 4  ;;  %s405_s21 = int_to_ptr.vmem [resolvable:$true] %s404_s21 }
  0x3d   : > { %s1823_s23 = scalar_lea.vmem %s405_s21, 16  ;;  %s1830_s17 = scalar_lea.vmem %s405_s21, 32 }
  0x3e   : > { %p1824_p11 = scmp.ne.s32.totalorder %s405_s21, %s1823_s23  ;;  %p1831_p3 = scmp.lt.s32.totalorder %s405_s21, %s405_s21 }
  0x3f   : > { %p1832_p2 = scmp.lt.s32.totalorder %s1830_s17, %s1823_s23 }
  0x40   : > { %p1826_p0 = pnand %p1824_p11, %p1736_p13 }
  0x41   : > { %p1833_p9 = por %p1832_p2, %p1831_p3 }
  0x42   : > { %p1827_p1 = pneg %p1826_p0 }
  0x44   : > { %p1834_p4 = pnand %p1833_p9, %p1827_p1 }
  0x46   : > { %1837 = shalt.err (!%p1834_p4)
}
  0x47   : > { %1636 = dma.hbm_to_vmem [thread:$0]  (!%p2062_p12), %s2314_s10, 16, %s405_s21, [#allocation10]  }
  0x48   : > { %430 = sbr.rel (%p2054_p10) target bundleno = 2525 (0x9dd), region = 72  ;;  %p2332_p6 = scmp.eq.s32.totalorder (!%p2054_p10), %s2026_s29, 0 }
  0x4d   : > { %1881 = dma.done.wait (%p2332_p6), [#allocation4], 16   ;;  %p2333_p13 = pmov %p2332_p6 }
  0x4e   : > { %p2334_p5 = pmov %p2332_p6 }
  0x4f   : > { %1883 = vsyncadd (%p2333_p13), [#allocation4], 4294967280 }
  0x50   : > { %1885 = dma.done.wait (%p2334_p5), [#allocation7], 272   ;;  %p2335_p7 = pmov %p2334_p5 }
  0x51   : > { %p2336_p8 = pmov %p2334_p5 }
  0x52   : > { %1887 = vsyncadd (%p2335_p7), [#allocation7], 4294967024 }
  0x53   : > { %1889 = dma.done.wait (%p2336_p8), [#allocation10], 16   ;;  %p2337_p12 = pmov %p2334_p5 }
  0x54   : > { %p485_p10 = scmp.lt.s32.totalorder %s2026_s29, 1  ;;  %vm493_vm0 = vcmask 261120   ;;  %v1704_v7 = vld [vmem:[%s2307_s3 + $0x8] sm:$0xff]   ;;  %v1918_v8 = vmov 0.0   ;;  %vm1919_vm1 = vmmov 0   ;;  %v1705_v9 = vld [vmem:[%s2307_s3] sm:$0xff]   ;;  %v589_v40 = vlaneseq }
  0x55   : > { %1891 = vsyncadd (%p2337_p12), [#allocation10], 4294967280  ;;  %1522 = vmatprep.subr.bf16.mxu0 %v1918_v8  ;;  %1526 = vmatprep.mubr.msk.bf16.mxu0 %vm1919_vm1, %v1918_v8  ;;  %v1452_v14 = vld [vmem:[%s2305_s1] ss:$0 sm:$0xff]  ;;  %s1920_s16 = smov 120   ;;  %s1922_s14 = smov 96  }
  0x56   : > { %s486_s7 = scalar_select %p485_p10, %s2026_s29, 1  ;;  %1523 = vmatpush3.bf16.msra.mxu0 %v1704_v7  ;;  %1530 = vmatprep.subr.bf16.mxu1 %v1918_v8  ;;  %v1453_v16 = vld [vmem:[%s2306_s2] ss:$0 sm:$0xff]  ;;  %vm600_vm2 = vcmask 64512   ;;  %v590_v41 = vshrl.u32 %v589_v40, 7  ;;  %v592_v42 = vand.u32 127, %v589_v40 }
  0x57   : > { %1524 = vmatprep.subr.bf16.mxu0 %v1918_v8  ;;  %1532 = vmatprep.mubr.msk.bf16.mxu1 %vm1919_vm1, %v1918_v8  ;;  %v1454_v20 = vld [vmem:[%s2308_s4] ss:$0 sm:$0xff]  ;;  %s1923_s24 = smov 72   ;;  %s1924_s15 = smov 80   ;;  %vm665_vm4 = vcmask 1043456   ;;  %vm710_vm5 = vcmask 60416  }
  0x58   : > { %s1451_s20 = sshll.u32 %s486_s7, 3  ;;  %s1925_s21 = smov 48   ;;  %vm593_vm3 = vcmp.le.s32.totalorder %v592_v42, %v590_v41  ;;  %vm831_vm6 = vcmask 126016   ;;  %vm951_vm7 = vcmask 191616   ;;  %vm1071_vm8 = vcmask 257216  }
  0x59   : > { %s488_s27 = scalar_lea.vmem %s2304_s0, %s1451_s20  ;;  %s1926_s23 = smov 56   ;;  %vm1278_vm9 = vcmask 523264  }
  0x5a   : > { %v2126_v0 = vld [vmem:[%s488_s27] sm:$0xff]  ;;  %1525 = vmatpush3.bf16.msra.mxu0 %v1705_v9  ;;  %s1921_s27 = smov 104   ;;  %s1927_s17 = smov 112  }
  0x5b   : > { %v494_v1 = vsel %vm493_vm0, %v2126_v0, 0.0  ;;  %1536 = vmatprep.subr.bf16.mxu0 %v1918_v8  ;;  %s1928_s22 = smov 88   ;;  %s1929_s7 = smov 64  }
  0x5c   : > { %495 = vadd.xlane.f32.xlu0 %v494_v1  ;;  %s1930_s20 = smov 40   ;;  %s1931_s30 = smov 8  }
  0x5d   : > { %p2338_p0 = scmp.ne.s32.totalorder %s2327_s18, 0 }
  0xe5   : > { %v496_v2 = vpop.xlane.xlu0 %495 }
  0xe6   : > { %v498_v3 = vmul.f32 0.03125, %v496_v2 }
  0xe8   : > { %v499_v4 = vsub.f32 %v2126_v0, %v498_v3 }
  0xea   : > { %v500_v5 = vmul.f32 %v499_v4, %v499_v4 }
  0xec   : > { %v501_v6 = vsel %vm493_vm0, %v500_v5, 0.0 }
  0xed   : > { %502 = vadd.xlane.f32.xlu0 %v501_v6 }
 0x176   : > { %v503_v10 = vpop.xlane.xlu0 %502 }
 0x177   : > { %v504_v11 = vmul.f32 0.03125, %v503_v10 }
 0x179   : > { %v505_v12 = vadd.f32 1e-05, %v504_v11 }
 0x17b   : > { %1714 = vrsqrt.f32 %v505_v12 }
 0x188   : > { %v1715_v13 = vpop.eup %1714 }
 0x189   : > { %v507_v15 = vmul.f32 %v1715_v13, %v499_v4 }
 0x18b   : > { %v514_v17 = vmul.f32 %v1452_v14, %v507_v15 }
 0x18d   : > { %v521_v18 = vadd.f32 %v1453_v16, %v514_v17 }
 0x18f   : > { %v522_v19 = vpack.c.bf16 %v521_v18, %v521_v18 }
 0x191   : > { %1527 = vmatmul.mubr.msk.bf16.vlgmr.msra.gmra.mxu0 %vm493_vm0, %v522_v19 }
 0x192   : > { %1538 = vmatprep.mubr.msk.bf16.mxu0 %vm1919_vm1, %v1918_v8 }
 0x251   : > { %v583_v21 = vpop.f32.mrf.mxu0 }
 0x252   : > { %v584_v22 = vadd.f32 %v1454_v20, %v583_v21 }
 0x253   : > { %v1528_v23 = vpop.f32.mrf.mxu0 }
 0x254   : > { %v594_v24 = vmul.f32 0.35355338, %v584_v22  ;;  %v2158_v25 = vpack.c.bf16 %v584_v22, %v584_v22 }
 0x255   : > { %v586_v26 = vpop.f32.mrf.mxu0 }
 0x256   : > { %v595_v27 = vpack.c.bf16 %v594_v24, %v594_v24  ;;  %598 = vrot.lane.b32.xlu1 %v2158_v25, %s1920_s16 }
 0x257   : > { %v1529_v28 = vpop.f32.mrf.mxu0 }
 0x258   : > { %713 = vrot.lane.b32.xlu0 %v595_v27, %s1921_s27 }
 0x25a   : > { %715 = vrot.lane.b32.xlu1 %v2158_v25, %s1922_s14 }
 0x25e   : > { %835 = vrot.lane.b32.xlu1 %v2158_v25, %s1923_s24  ;;  %s1934_s24 = smov [#allocation11]  }
 0x262   : > { %833 = vrot.lane.b32.xlu1 %v595_v27, %s1924_s15  ;;  %s1932_s15 = smov 16  }
 0x266   : > { %955 = vrot.lane.b32.xlu1 %v2158_v25, %s1925_s21  ;;  %s1933_s21 = smov 24  }
 0x26a   : > { %953 = vrot.lane.b32.xlu1 %v595_v27, %s1926_s23 }
 0x2c8   : > { %v599_v29 = vpop.permute.xlu1 %598 }
 0x2c9   : > { %v605_v30 = vsel %vm600_vm2, %v599_v29, 0 }
 0x2ca   : > { %1531 = vmatpush3.bf16.xpose.msra.mxu1 %v605_v30  ;;  %v714_v34 = vpop.permute.xlu0 %713 }
 0x2cb   : > { %1542 = vmatprep.subr.bf16.mxu1 %v1918_v8 }
 0x2cc   : > { %v716_v31 = vpop.permute.xlu1 %715 }
 0x2cd   : > { %v721_v32 = vsel %vm600_vm2, %v716_v31, 0 }
 0x2d0   : > { %v836_v33 = vpop.permute.xlu1 %835 }
 0x2d1   : > { %1533 = vmatmul.mubr.msk.bf16.vlgmr.msra.gmra.mxu1 %vm600_vm2, %v595_v27  ;;  %v841_v36 = vsel %vm600_vm2, %v836_v33, 0 }
 0x2d2   : > { %1543 = vmatpush3.bf16.xpose.msra.mxu1 %v721_v32  ;;  %1544 = vmatprep.mubr.msk.bf16.mxu1 %vm1919_vm1, %v1918_v8 }
 0x2d3   : > { %1554 = vmatprep.subr.bf16.mxu1 %v1918_v8 }
 0x2d4   : > { %v834_v35 = vpop.permute.xlu1 %833 }
 0x2d8   : > { %v956_v37 = vpop.permute.xlu1 %955 }
 0x2d9   : > { %1545 = vmatmul.mubr.msk.bf16.vlgmr.msra.gmra.mxu1 %vm600_vm2, %v714_v34  ;;  %v961_v38 = vsel %vm600_vm2, %v956_v37, 0 }
 0x2da   : > { %1555 = vmatpush3.bf16.xpose.msra.mxu1 %v841_v36  ;;  %1556 = vmatprep.mubr.msk.bf16.mxu1 %vm1919_vm1, %v1918_v8 }
 0x2db   : > { %1566 = vmatprep.subr.bf16.mxu1 %v1918_v8 }
 0x2dc   : > { %v954_v39 = vpop.permute.xlu1 %953 }
 0x2e1   : > { %1557 = vmatmul.mubr.msk.bf16.vlgmr.msra.gmra.mxu1 %vm600_vm2, %v834_v35 }
 0x2e2   : > { %1567 = vmatpush3.bf16.xpose.msra.mxu1 %v961_v38  ;;  %1568 = vmatprep.mubr.msk.bf16.mxu1 %vm1919_vm1, %v1918_v8 }
 0x2e3   : > { %1578 = vmatprep.subr.bf16.mxu1 %v1918_v8 }
 0x2e9   : > { %1569 = vmatmul.mubr.msk.bf16.vlgmr.msra.gmra.mxu1 %vm600_vm2, %v954_v39 }
 0x2ea   : > { %1582 = vmatprep.mubr.msk.bf16.mxu1 %vm1919_vm1, %v1918_v8 }
 0x391   : > { %v641_v43 = vpop.f32.mrf.mxu1 }
 0x392   : > { %v647_v44 = vsel %vm593_vm3, %v641_v43, -1e+09 }
 0x393   : > { %v1534_v45 = vpop.f32.mrf.mxu1  ;;  %v648_v46 = vsel %vm600_vm2, %v647_v44, -inf }
 0x394   : > { %649 = vmax.xlane.f32.xlu1 %v648_v46 }
 0x395   : > { %v644_v47 = vpop.f32.mrf.mxu1 }
 0x397   : > { %v1535_v48 = vpop.f32.mrf.mxu1 }
 0x399   : > { %v757_v49 = vpop.f32.mrf.mxu1 }
 0x39a   : > { %v763_v50 = vsel %vm593_vm3, %v757_v49, -1e+09 }
 0x39b   : > { %v1546_v51 = vpop.f32.mrf.mxu1  ;;  %v764_v52 = vsel %vm600_vm2, %v763_v50, -inf }
 0x39c   : > { %765 = vmax.xlane.f32.xlu0 %v764_v52 }
 0x39d   : > { %v760_v53 = vpop.f32.mrf.mxu1 }
 0x39f   : > { %v1547_v54 = vpop.f32.mrf.mxu1 }
 0x3a1   : > { %v877_v55 = vpop.f32.mrf.mxu1 }
 0x3a2   : > { %v883_v56 = vsel %vm593_vm3, %v877_v55, -1e+09 }
 0x3a3   : > { %v1558_v57 = vpop.f32.mrf.mxu1  ;;  %v884_v58 = vsel %vm600_vm2, %v883_v56, -inf }
 0x3a4   : > { %885 = vmax.xlane.f32.xlu1 %v884_v58 }
 0x3a5   : > { %v880_v59 = vpop.f32.mrf.mxu1 }
 0x3a6   : > { %v1706_v59 = vld [vmem:[%s2309_s5 + $0x8] sm:$0xff]  }
 0x3a7   : > { %v1559_v60 = vpop.f32.mrf.mxu1  ;;  %1579 = vmatpush3.bf16.msra.mxu1 %v1706_v59 }
 0x3a8   : > { %1580 = vmatprep.subr.bf16.mxu1 %v1918_v8 }
 0x3a9   : > { %v997_v61 = vpop.f32.mrf.mxu1 }
 0x3aa   : > { %v1003_v62 = vsel %vm593_vm3, %v997_v61, -1e+09  ;;  %v1707_v61 = vld [vmem:[%s2309_s5] sm:$0xff]  }
 0x3ab   : > { %v1570_v63 = vpop.f32.mrf.mxu1  ;;  %v1004_v1 = vsel %vm600_vm2, %v1003_v62, -inf  ;;  %1581 = vmatpush3.bf16.msra.mxu1 %v1707_v61 }
 0x3ac   : > { %1005 = vmax.xlane.f32.xlu0 %v1004_v1  ;;  %1594 = vmatprep.subr.bf16.mxu1 %v1918_v8 }
 0x3ad   : > { %v1000_v2 = vpop.f32.mrf.mxu1 }
 0x3af   : > { %v1571_v3 = vpop.f32.mrf.mxu1 }
 0x41d   : > { %v650_v4 = vpop.xlane.xlu1 %649 }
 0x41e   : > { %v651_v5 = vsub.f32 %v647_v44, %v650_v4 }
 0x420   : > { %v652_v6 = vmul.f32 1.442695, %v651_v5 }
 0x422   : > { %1716 = vpow2.f32 %v652_v6 }
 0x425   : > { %v766_v7 = vpop.xlane.xlu0 %765 }
 0x426   : > { %v767_v9 = vsub.f32 %v763_v50, %v766_v7 }
 0x428   : > { %v768_v10 = vmul.f32 1.442695, %v767_v9 }
 0x42a   : > { %1718 = vpow2.f32 %v768_v10 }
 0x42d   : > { %v886_v20 = vpop.xlane.xlu1 %885 }
 0x42e   : > { %v887_v21 = vsub.f32 %v883_v56, %v886_v20 }
 0x42f   : > { %v1717_v11 = vpop.eup %1716 }
 0x430   : > { %v654_v12 = vsel %vm600_vm2, %v1717_v11, 0.0  ;;  %v888_v22 = vmul.f32 1.442695, %v887_v21 }
 0x431   : > { %655 = vadd.xlane.f32.xlu1 %v654_v12 }
 0x435   : > { %v1006_v13 = vpop.xlane.xlu0 %1005 }
 0x436   : > { %v1007_v14 = vsub.f32 %v1003_v62, %v1006_v13  ;;  %v1469_v13 = vld [vmem:[%s2310_s6] ss:$0 sm:$0xff] }
 0x437   : > { %v1719_v15 = vpop.eup %1718 }
 0x438   : > { %v1008_v16 = vmul.f32 1.442695, %v1007_v14  ;;  %v770_v17 = vsel %vm600_vm2, %v1719_v15, 0.0 }
 0x439   : > { %771 = vadd.xlane.f32.xlu0 %v770_v17 }
 0x43a   : > { %1720 = vpow2.f32 %v1008_v16 }
 0x43b   : > { %1722 = vpow2.f32 %v888_v22 }
 0x442   : > { %660 = vrot.lane.b32.xlu1 %v2158_v25, %s1927_s17 }
 0x447   : > { %v1721_v18 = vpop.eup %1720 }
 0x448   : > { %v1010_v19 = vsel %vm600_vm2, %v1721_v18, 0.0  ;;  %v1723_v23 = vpop.eup %1722 }
 0x449   : > { %1011 = vadd.xlane.f32.xlu0 %v1010_v19  ;;  %v890_v24 = vsel %vm600_vm2, %v1723_v23, 0.0 }
 0x45f   : > { %776 = vrot.lane.b32.xlu0 %v2158_v25, %s1928_s22  ;;  %s1486_s22 = sshll.u32 %s2026_s29, 7 }
 0x460   : > { %s2262_s27 = scalar_lea.hbm %s2317_s13, %s1486_s22 }
 0x466   : > { %891 = vadd.xlane.f32.xlu1 %v890_v24 }
 0x477   : > { %896 = vrot.lane.b32.xlu1 %v2158_v25, %s1929_s7 }
 0x47b   : > { %1016 = vrot.lane.b32.xlu1 %v2158_v25, %s1930_s20 }
 0x4ba   : > { %v656_v26 = vpop.xlane.xlu1 %655 }
 0x4bb   : > { %1724 = vrcp.f32 %v656_v26 }
 0x4be   : > { %v661_v27 = vpop.permute.xlu1 %660 }
 0x4bf   : > { %v667_v28 = vsel %vm665_vm4, %v661_v27, 0  ;;  %v1708_v27 = vld [vmem:[#allocation8 + $0x8] sm:$0xff]  }
 0x4c0   : > { %1537 = vmatpush3.bf16.msra.mxu0 %v667_v28  ;;  %v1709_v28 = vld [vmem:[#allocation8] sm:$0xff]  }
 0x4c1   : > { %1548 = vmatprep.subr.bf16.mxu0 %v1918_v8 }
 0x4c2   : > { %v772_v29 = vpop.xlane.xlu0 %771 }
 0x4c3   : > { %1726 = vrcp.f32 %v772_v29  ;;  %v1711_v29 = vld [vmem:[%s2315_s11 + $0x10] sm:$0xff]  }
 0x4c8   : > { %v1725_v30 = vpop.eup %1724 }
 0x4c9   : > { %v658_v31 = vmul.f32 %v1725_v30, %v1717_v11 }
 0x4cb   : > { %v659_v32 = vpack.c.bf16 %v658_v31, %v658_v31 }
 0x4cd   : > { %1539 = vmatmul.mubr.msk.bf16.vlgmr.msra.gmra.mxu0 %vm600_vm2, %v659_v32 }
 0x4ce   : > { %1550 = vmatprep.mubr.msk.bf16.mxu0 %vm1919_vm1, %v1918_v8 }
 0x4d0   : > { %v1727_v25 = vpop.eup %1726 }
 0x4d1   : > { %v774_v34 = vmul.f32 %v1727_v25, %v1719_v15 }
 0x4d2   : > { %v1012_v33 = vpop.xlane.xlu0 %1011 }
 0x4d3   : > { %v775_v37 = vpack.c.bf16 %v774_v34, %v774_v34 }
 0x4d6   : > { %v777_v35 = vpop.permute.xlu0 %776 }
 0x4d7   : > { %v782_v36 = vsel %vm665_vm4, %v777_v35, 0  ;;  %v1474_v35 = vld [vmem:[#allocation6] ss:$0 sm:$0xff] }
 0x4d8   : > { %1549 = vmatpush3.bf16.msra.mxu0 %v782_v36 }
 0x4d9   : > { %1560 = vmatprep.subr.bf16.mxu0 %v1918_v8 }
 0x4db   : > { %1551 = vmatmul.mubr.msk.bf16.vlgmr.msra.gmra.mxu0 %vm600_vm2, %v775_v37 }
 0x4dc   : > { %1562 = vmatprep.mubr.msk.bf16.mxu0 %vm1919_vm1, %v1918_v8 }
 0x4ef   : > { %v892_v38 = vpop.xlane.xlu1 %891 }
 0x4f0   : > { %1728 = vrcp.f32 %v892_v38 }
 0x4f1   : > { %1730 = vrcp.f32 %v1012_v33  ;;  %v1473_v33 = vld [vmem:[#allocation3] ss:$0 sm:$0xff] }
 0x4f3   : > { %v897_v39 = vpop.permute.xlu1 %896 }
 0x4f4   : > { %v902_v40 = vsel %vm665_vm4, %v897_v39, 0  ;;  %v1712_v39 = vld [vmem:[%s2315_s11 + $0x8] sm:$0xff]  }
 0x4f5   : > { %1561 = vmatpush3.bf16.msra.mxu0 %v902_v40  ;;  %v1713_v40 = vld [vmem:[%s2315_s11] sm:$0xff]  }
 0x4f6   : > { %1572 = vmatprep.subr.bf16.mxu0 %v1918_v8 }
 0x4f7   : > { %v1017_v43 = vpop.permute.xlu1 %1016 }
 0x4f8   : > { %v1022_v46 = vsel %vm665_vm4, %v1017_v43, 0 }
 0x4fd   : > { %v1729_v41 = vpop.eup %1728 }
 0x4fe   : > { %v894_v42 = vmul.f32 %v1729_v41, %v1723_v23  ;;  %v1731_v45 = vpop.eup %1730  ;;  %v1475_v41 = vld [vmem:[#allocation9] ss:$0 sm:$0xff] }
 0x4ff   : > { %v1014_v47 = vmul.f32 %v1731_v45, %v1721_v18 }
 0x500   : > { %v895_v44 = vpack.c.bf16 %v894_v42, %v894_v42 }
 0x501   : > { %v1015_v48 = vpack.c.bf16 %v1014_v47, %v1014_v47 }
 0x502   : > { %1563 = vmatmul.mubr.msk.bf16.vlgmr.msra.gmra.mxu0 %vm600_vm2, %v895_v44 }
 0x503   : > { %1573 = vmatpush3.bf16.msra.mxu0 %v1022_v46  ;;  %1574 = vmatprep.mubr.msk.bf16.mxu0 %vm1919_vm1, %v1918_v8 }
 0x504   : > { %1586 = vmatprep.subr.bf16.mxu0 %v1918_v8 }
 0x50a   : > { %1575 = vmatmul.mubr.msk.bf16.vlgmr.msra.gmra.mxu0 %vm600_vm2, %v1015_v48 }
 0x50b   : > { %1590 = vmatprep.mubr.msk.bf16.mxu0 %vm1919_vm1, %v1918_v8  ;;  %1587 = vmatpush3.bf16.msra.mxu0 %v1708_v27 }
 0x50c   : > { %1588 = vmatprep.subr.bf16.mxu0 %v1918_v8 }
 0x50f   : > { %1589 = vmatpush3.bf16.msra.mxu0 %v1709_v28 }
 0x58d   : > { %v703_v49 = vpop.f32.mrf.mxu0 }
 0x58e   : > { %v709_v50 = vpack.c.bf16 %v703_v49, %v703_v49 }
 0x58f   : > { %v1540_v51 = vpop.f32.mrf.mxu0 }
 0x590   : > { %711 = vst.msk [vmem:[#allocation2] sm:$0xf] %vm710_vm5, %v709_v50 }
 0x591   : > { %v706_v52 = vpop.f32.mrf.mxu0 }
 0x593   : > { %v1541_v53 = vpop.f32.mrf.mxu0 }
 0x59b   : > { %v818_v54 = vpop.f32.mrf.mxu0 }
 0x59c   : > { %v1489_v55 = vpack.c.bf16 %v818_v54, %v818_v54 }
 0x59d   : > { %v1552_v56 = vpop.f32.mrf.mxu0 }
 0x59e   : > { %828 = vrot.lane.b32.xlu0 %v1489_v55, %s1931_s30 }
 0x59f   : > { %v821_v57 = vpop.f32.mrf.mxu0 }
 0x5a1   : > { %v1553_v58 = vpop.f32.mrf.mxu0 }
 0x5c2   : > { %v938_v60 = vpop.f32.mrf.mxu0 }
 0x5c3   : > { %v1490_v62 = vpack.c.bf16 %v938_v60, %v938_v60 }
 0x5c4   : > { %v1564_v63 = vpop.f32.mrf.mxu0 }
 0x5c5   : > { %948 = vrot.lane.b32.xlu1 %v1490_v62, %s1932_s15  ;;  %s482_s15 = sand.u32 1, %s1902_s26  }
 0x5c6   : > { %v941_v1 = vpop.f32.mrf.mxu0  ;;  %s1325_s29 = scalar_lea.sflag [#allocation5], %s482_s15 }
 0x5c8   : > { %v1565_v2 = vpop.f32.mrf.mxu0 }
 0x5ca   : > { %v1058_v3 = vpop.f32.mrf.mxu0 }
 0x5cb   : > { %v1491_v4 = vpack.c.bf16 %v1058_v3, %v1058_v3 }
 0x5cc   : > { %v1576_v5 = vpop.f32.mrf.mxu0 }
 0x5cd   : > { %1068 = vrot.lane.b32.xlu0 %v1491_v4, %s1933_s21  ;;  %s1450_s21 = sshll.u32 %s482_s15, 3 }
 0x5ce   : > { %v1061_v6 = vpop.f32.mrf.mxu0  ;;  %s484_s7 = scalar_lea.vmem [#allocation11], %s1450_s21  ;;  %s1842_s21 = sshll.u32 %s1934_s24, 4  ;;  %s1843_s21 = int_to_ptr.vmem [resolvable:$false] %s1842_s21 }
 0x5cf   : > { %s1338_s20 = sshll.u32 %s484_s7, 4  ;;  %s1844_s23 = scalar_lea.vmem %s1843_s21, 256  ;;  %s2264_s20 = int_to_ptr.vmem [resolvable:$true] %s1338_s20 }
 0x5d0   : > { %v1577_v7 = vpop.f32.mrf.mxu0  ;;  %s1838_s14 = scalar_lea.vmem %s2264_s20, 128  ;;  %p1845_p2 = scmp.lt.s32.totalorder %s2264_s20, %s1843_s21 }
 0x5d1   : > { %p1839_p11 = scmp.ne.s32.totalorder %s2264_s20, %s1838_s14  ;;  %p1846_p9 = scmp.lt.s32.totalorder %s1844_s23, %s1838_s14 }
 0x5d3   : > { %p1840_p1 = pnand %p1839_p11, %p2338_p0  ;;  %p1847_p4 = por %p1846_p9, %p1845_p2 }
 0x5d5   : > { %p1841_p3 = pneg %p1840_p1 }
 0x5d7   : > { %p1848_p6 = pnand %p1847_p4, %p1841_p3 }
 0x610   : > { %v829_v9 = vpop.permute.xlu0 %828 }
 0x611   : > { %832 = vst.msk [vmem:[#allocation2] sm:$0xf] %vm831_vm6, %v829_v9 }
 0x637   : > { %v949_v10 = vpop.permute.xlu1 %948 }
 0x638   : > { %952 = vst.msk [vmem:[#allocation2] sm:$0xf] %vm951_vm7, %v949_v10 }
 0x63f   : > { %v1069_v11 = vpop.permute.xlu0 %1068 }
 0x640   : > { %1072 = vst.msk [vmem:[#allocation2] sm:$0xf] %vm1071_vm8, %v1069_v11 }
 0x647   : > { %v1073_v12 = vld [vmem:[#allocation2] sm:$0xf] }
 0x648   : > { %1583 = vmatmul.mubr.msk.bf16.vlgmr.msra.gmra.mxu1 %vm493_vm0, %v1073_v12 }
 0x649   : > { %1602 = vmatprep.mubr.msk.bf16.mxu1 %vm1919_vm1, %v1918_v8 }
 0x708   : > { %v1134_v14 = vpop.f32.mrf.mxu1 }
 0x709   : > { %v1135_v15 = vadd.f32 %v1469_v13, %v1134_v14 }
 0x70a   : > { %v1584_v16 = vpop.f32.mrf.mxu1 }
 0x70b   : > { %v1140_v17 = vadd.f32 %v1135_v15, %v2126_v0  ;;  %v1710_v0 = vld [vmem:[%s2315_s11 + $0x18] sm:$0xff]  }
 0x70c   : > { %v1137_v18 = vpop.f32.mrf.mxu1  ;;  %1595 = vmatpush3.bf16.msra.mxu1 %v1710_v0 }
 0x70d   : > { %v1143_v19 = vsel %vm493_vm0, %v1140_v17, 0.0  ;;  %1596 = vmatprep.subr.bf16.mxu1 %v1918_v8 }
 0x70e   : > { %1144 = vadd.xlane.f32.xlu1 %v1143_v19  ;;  %v1585_v20 = vpop.f32.mrf.mxu1 }
 0x710   : > { %1597 = vmatpush3.bf16.msra.mxu1 %v1711_v29 }
 0x711   : > { %1598 = vmatprep.subr.bf16.mxu1 %v1918_v8 }
 0x714   : > { %1599 = vmatpush3.bf16.msra.mxu1 %v1712_v39 }
 0x715   : > { %1600 = vmatprep.subr.bf16.mxu1 %v1918_v8  ;;  %v1479_v8 = vld [vmem:[%s2316_s12] ss:$0 sm:$0xff] }
 0x718   : > { %1601 = vmatpush3.bf16.msra.mxu1 %v1713_v40 }
 0x797   : > { %v1145_v21 = vpop.xlane.xlu1 %1144 }
 0x798   : > { %v1146_v22 = vmul.f32 0.03125, %v1145_v21 }
 0x79a   : > { %v1147_v23 = vsub.f32 %v1140_v17, %v1146_v22 }
 0x79c   : > { %v1148_v24 = vmul.f32 %v1147_v23, %v1147_v23 }
 0x79e   : > { %v1149_v26 = vsel %vm493_vm0, %v1148_v24, 0.0 }
 0x79f   : > { %1150 = vadd.xlane.f32.xlu0 %v1149_v26 }
 0x828   : > { %v1151_v30 = vpop.xlane.xlu0 %1150 }
 0x829   : > { %v1152_v31 = vmul.f32 0.03125, %v1151_v30 }
 0x82b   : > { %v1153_v32 = vadd.f32 1e-05, %v1152_v31 }
 0x82d   : > { %1732 = vrsqrt.f32 %v1153_v32 }
 0x83a   : > { %v1733_v25 = vpop.eup %1732 }
 0x83b   : > { %v1155_v34 = vmul.f32 %v1733_v25, %v1147_v23 }
 0x83d   : > { %v1162_v36 = vmul.f32 %v1473_v33, %v1155_v34 }
 0x83f   : > { %v1169_v37 = vadd.f32 %v1474_v35, %v1162_v36 }
 0x841   : > { %v1170_v38 = vpack.c.bf16 %v1169_v37, %v1169_v37 }
 0x843   : > { %1591 = vmatmul.mubr.msk.bf16.vlgmr.msra.gmra.mxu0 %vm493_vm0, %v1170_v38 }
 0x903   : > { %v1231_v42 = vpop.f32.mrf.mxu0 }
 0x904   : > { %v1232_v43 = vadd.f32 %v1475_v41, %v1231_v42 }
 0x905   : > { %v1592_v44 = vpop.f32.mrf.mxu0 }
 0x906   : > { %v1237_v45 = vmax.f32 %v1232_v43, 0.0 }
 0x907   : > { %v1234_v46 = vpop.f32.mrf.mxu0 }
 0x908   : > { %v1238_v47 = vpack.c.bf16 %v1237_v45, %v1237_v45 }
 0x909   : > { %v1593_v48 = vpop.f32.mrf.mxu0 }
 0x90a   : > { %1603 = vmatmul.mubr.msk.bf16.vlgmr.msra.gmra.mxu1 %vm1278_vm9, %v1238_v47 }
 0x9ca   : > { %v1316_v49 = vpop.f32.mrf.mxu1 }
 0x9cb   : > { %v1317_v50 = vadd.f32 %v1479_v8, %v1316_v49 }
 0x9cc   : > { %v1604_v51 = vpop.f32.mrf.mxu1 }
 0x9cd   : > { %v1322_v52 = vadd.f32 %v1317_v50, %v1140_v17 }
 0x9ce   : > { %v1319_v53 = vpop.f32.mrf.mxu1 }
 0x9cf   : > { %1323 = vst.msk [vmem:[%s484_s7] sm:$0xff] %vm493_vm0, %v1322_v52 }
 0x9d0   : > { %v1605_v54 = vpop.f32.mrf.mxu1 }
 0x9d1   : > { %1851 = shalt.err (!%p1848_p6)
}
 0x9d2   : > { %s1852_s17 = scalar_lea.hbm %s2262_s27, 128  ;;  %s1856_s7 = scalar_lea.hbm %s2317_s13, 256 }
 0x9d3   : > { %p1853_p13 = scmp.ne.s32.totalorder %s2262_s27, %s1852_s17  ;;  %p1857_p8 = scmp.lt.s32.totalorder %s2262_s27, %s2317_s13 }
 0x9d4   : > { %p1858_p12 = scmp.lt.s32.totalorder %s1856_s7, %s1852_s17 }
 0x9d5   : > { %p1854_p5 = pnand %p1853_p13, %p2338_p0 }
 0x9d6   : > { %p1859_p10 = por %p1858_p12, %p1857_p8 }
 0x9d7   : > { %p1855_p7 = pneg %p1854_p5 }
 0x9d9   : > { %p1860_p11 = pnand %p1859_p10, %p1855_p7 }
 0x9db   : > { %1863 = shalt.err (!%p1860_p11)
}
 0x9dc   : > { %1622 = dma.vmem_to_hbm [thread:$0]  (%p2338_p0), %s2264_s20, 128, %s2262_s27, %s1325_s29  }
 0x9dd PF: > { %p1649_p1 = scmp.ge.s32.totalorder %s1910_s28, 2  ;;  %s1350_s14 = sand.u32 1, %s1898_s25  }
 0x9de   : > { %p2339_p3 = scmp.ne.s32.totalorder %s2328_s19, 0  ;;  %s1351_s24 = scalar_lea.sflag [#allocation5], %s1350_s14 }
 0x9e0   : > { %p1638_p2 = pnand %p1649_p1, %p2339_p3 }
 0x9e2   : > { %p1639_p9 = pneg %p1638_p2 }
 0x9e4   : > { %1893 = dma.done.wait (%p1639_p9), %s1351_s24, 128  }
 0x9e5   : > { %1895 = vsyncadd (%p1639_p9), %s1351_s24, 4294967168  ;;  %s2340_s28 = sld [smem:[#allocation17_spill]]  ;;  %s2343_s25 = smov %s1902_s26 }
 0x9e6   : > { %s2341_s21 = sld [smem:[#allocation16_spill]] }
 0x9e7   : > { %s2342_s27 = sld [smem:[#allocation18_spill]] }
 0x9eb   : > { %p26_p4 = scmp.ge.s32.totalorder %s2340_s28, 4  }
 0x9ec   : > { %s2344_s26 = smov %s2341_s21 }
 0x9ed   :  { %28 = sbr.rel (!%p26_p4) target bundleno = 8 (0x8), region = 124 }
 0x9f2   :  { %1356 = vsyncpa [#allocation4], 1 }
 0x9f3   :  { %1358 = vsyncpa [#allocation4 + $0x1], 1 }
 0x9f4   :  { %1359 = vsyncpa [#allocation7], 1 }
 0x9f5   :  { %1360 = vsyncpa [#allocation10], 1 }
 0x9f6   :  { %1361 = vsyncpa [#allocation5], 1 }
 0x9f7   :  { %1363 = vsyncpa [#allocation5 + $0x1], 1 }

</bundles_post_ra>
